<compile_context>
chip_gen: v5e
topology: v5e:2x2
jax: 0.10.0
libtpu: 0.0.40
codegen_flags: <defaults>
</compile_context>

<pallas_src>
import functools

import jax
import jax.numpy as jnp
from jax.experimental import pallas as pl
from jax.experimental.pallas import tpu as pltpu


VMEM_LIMIT_BYTES = 48 * 1024 * 1024   # explicit cap; safe for v5e/v6e/v7x


def _round_up(x, m):
    return (x + m - 1) // m * m


def _activate(y, act):
    if act == "relu":
        return jnp.maximum(y, 0.0)
    if act == "tanh":
        return jnp.tanh(y)
    if act == "leaky":
        return jnp.where(y > 0, y, 0.01 * y)   # torch LeakyReLU default slope
    return y


# -----------------------------------------------------------------------------
# Matmul kernel (bf16 in, f32 accumulate directly in the resident output block)
# -----------------------------------------------------------------------------
def _matmul_kernel(a_ref, b_ref, o_ref, *, act, nk):
    p = jnp.dot(a_ref[...], b_ref[...], preferred_element_type=jnp.float32)
    if nk == 1:
        o_ref[...] = _activate(p, act)
    else:
        k = pl.program_id(2)

        @pl.when(k == 0)
        def _():
            o_ref[...] = p

        @pl.when(k > 0)
        def _():
            o_ref[...] = o_ref[...] + p

        if act != "none":
            @pl.when(k == nk - 1)
            def _():
                o_ref[...] = _activate(o_ref[...], act)


def pallas_matmul(a, b, act="none"):
    """a: (M, K), b: (K, N) -> (M, N) f32 with fused activation epilogue."""
    M, K = a.shape
    K2, N = b.shape
    assert K == K2
    a = a.astype(jnp.bfloat16)
    b = b.astype(jnp.bfloat16)

    tn = min(256, _round_up(N, 128))
    Np = _round_up(N, tn)
    kp128 = _round_up(K, 128)
    tk = kp128 if kp128 <= 2048 else 512          # full-K block when it fits
    Kp = _round_up(K, tk)
    tm = 512 if M > 2048 else min(256, _round_up(M, 8))
    Mp = _round_up(M, tm)

    if (Mp, Kp) != (M, K):
        a = jnp.pad(a, ((0, Mp - M), (0, Kp - K)))
    if (Kp, Np) != (K, N):
        b = jnp.pad(b, ((0, Kp - K), (0, Np - N)))

    ni, nj, nk = Mp // tm, Np // tn, Kp // tk

    cost = pl.CostEstimate(
        flops=2 * Mp * Np * Kp,
        transcendentals=(Mp * Np if act == "tanh" else 0),
        bytes_accessed=(Mp * Kp + Kp * Np) * 2 + Mp * Np * 4)

    out = pl.pallas_call(
        functools.partial(_matmul_kernel, act=act, nk=nk),
        out_shape=jax.ShapeDtypeStruct((Mp, Np), jnp.float32),
        # grid order (j, i, k): B's block index only depends on (k, j), so the
        # weight tile stays VMEM-resident for the whole i sweep (no refetch).
        grid=(nj, ni, nk),
        in_specs=[
            pl.BlockSpec((tm, tk), lambda j, i, k: (i, k)),
            pl.BlockSpec((tk, tn), lambda j, i, k: (k, j)),
        ],
        out_specs=pl.BlockSpec((tm, tn), lambda j, i, k: (i, j)),
        compiler_params=pltpu.CompilerParams(
            dimension_semantics=("parallel", "parallel", "arbitrary"),
            vmem_limit_bytes=VMEM_LIMIT_BYTES),
        cost_estimate=cost,
    )(a, b)
    if (Mp, Np) != (M, N):
        out = out[:M, :N]
    return out


def conv2d(x, w, stride=1, padding=0, act="none"):
    """x: NHWC, w: (kh, kw, Cin, Cout). bf16 im2col + Pallas matmul."""
    # TODO(synk): fold the kh*kw taps into the matmul grid (shifted A windows
    #             over the padded image) instead of materializing im2col.
    N, H, W, Cin = x.shape
    kh, kw, _, Cout = w.shape
    xp = jnp.pad(x, ((0, 0), (padding, padding), (padding, padding), (0, 0)))
    xp = xp.astype(jnp.bfloat16)                      # halve patch HBM bytes
    Ho = (H + 2 * padding - kh) // stride + 1
    Wo = (W + 2 * padding - kw) // stride + 1
    cols = []
    for dy in range(kh):
        for dx in range(kw):
            cols.append(xp[:, dy:dy + Ho * stride:stride,
                           dx:dx + Wo * stride:stride, :])
    patches = jnp.concatenate(cols, axis=-1)          # (N, Ho, Wo, kh*kw*Cin)
    a = patches.reshape(N * Ho * Wo, kh * kw * Cin)
    bm = w.reshape(kh * kw * Cin, Cout)
    out = pallas_matmul(a, bm, act=act)
    return out.reshape(N, Ho, Wo, Cout)


# -----------------------------------------------------------------------------
# Tiled instance-norm statistics + modulation kernels
# -----------------------------------------------------------------------------
def _pack_factor(C, hw):
    """Fold spatial positions into the lane axis when C < 128 (lane-dense)."""
    if C >= 128 or 128 % C != 0:
        return 1
    p = 128 // C
    while p > 1 and hw % p != 0:
        p //= 2
    return p


def _spatial_tile(hw, cp, target_bytes=2 * 1024 * 1024):
    """Largest power-of-two divisor of hw whose f32 tile is ~<= target_bytes."""
    target = max(8, target_bytes // (cp * 4))
    if hw <= target:
        return hw
    t = 1
    while t * 2 <= target and hw % (t * 2) == 0:
        t *= 2
    return t if (t >= 8 and hw % t == 0) else hw


def _stats_kernel(x_ref, sum_ref, ssq_ref):
    s = pl.program_id(1)

    @pl.when(s == 0)
    def _():
        sum_ref[...] = jnp.zeros_like(sum_ref)
        ssq_ref[...] = jnp.zeros_like(ssq_ref)

    x = x_ref[...].astype(jnp.float32)
    sum_ref[...] += jnp.sum(x, axis=1, keepdims=True)
    ssq_ref[...] += jnp.sum(x * x, axis=1, keepdims=True)


def _instance_stats(xp):
    """xp: (N, HWp, Cp) packed -> per-lane sum and sum-of-squares (N, 1, Cp)."""
    N, HWp, Cp = xp.shape
    T = _spatial_tile(HWp, Cp)
    nt = HWp // T
    return pl.pallas_call(
        _stats_kernel,
        out_shape=(jax.ShapeDtypeStruct((N, 1, Cp), jnp.float32),
                   jax.ShapeDtypeStruct((N, 1, Cp), jnp.float32)),
        grid=(N, nt),
        in_specs=[pl.BlockSpec((1, T, Cp), lambda n, s: (n, s, 0))],
        out_specs=(pl.BlockSpec((1, 1, Cp), lambda n, s: (n, 0, 0)),
                   pl.BlockSpec((1, 1, Cp), lambda n, s: (n, 0, 0))),
        compiler_params=pltpu.CompilerParams(
            dimension_semantics=("parallel", "arbitrary"),
            vmem_limit_bytes=VMEM_LIMIT_BYTES),
    )(xp)


def _instance_mean_rstd(xp, C, pack, hw, eps):
    """Finalize per-(batch, channel) mean / rstd from packed partial sums."""
    N = xp.shape[0]
    s, q = _instance_stats(xp)
    s = s.reshape(N, pack, C).sum(axis=1)
    q = q.reshape(N, pack, C).sum(axis=1)
    mean = s / hw
    var = q / hw - mean * mean                 # biased variance (torch IN)
    rstd = jax.lax.rsqrt(jnp.maximum(var, 0.0) + eps)
    return mean, rstd                          # each (N, C)


def _scale_shift_kernel(x_ref, a_ref, b_ref, o_ref, *, act):
    y = x_ref[...].astype(jnp.float32) * a_ref[...] + b_ref[...]
    o_ref[...] = _activate(y, act).astype(o_ref.dtype)


def _apply_scale_shift(xp, scale, shift, act="none"):
    """xp: (N, HWp, Cp); scale/shift: (N, Cp) per-batch per-lane."""
    N, HWp, Cp = xp.shape
    T = _spatial_tile(HWp, Cp)
    nt = HWp // T
    scale = scale.reshape(N, 1, Cp).astype(jnp.float32)
    shift = shift.reshape(N, 1, Cp).astype(jnp.float32)
    return pl.pallas_call(
        functools.partial(_scale_shift_kernel, act=act),
        out_shape=jax.ShapeDtypeStruct((N, HWp, Cp), xp.dtype),
        grid=(N, nt),
        in_specs=[pl.BlockSpec((1, T, Cp), lambda n, s: (n, s, 0)),
                  pl.BlockSpec((1, 1, Cp), lambda n, s: (n, 0, 0)),
                  pl.BlockSpec((1, 1, Cp), lambda n, s: (n, 0, 0))],
        out_specs=pl.BlockSpec((1, T, Cp), lambda n, s: (n, s, 0)),
        compiler_params=pltpu.CompilerParams(
            dimension_semantics=("parallel", "parallel"),
            vmem_limit_bytes=VMEM_LIMIT_BYTES),
    )(xp, scale, shift)


def _spade_apply_kernel(x_ref, g_ref, bt_ref, mu_ref, rs_ref, o_ref, *, act):
    x = x_ref[...].astype(jnp.float32)
    xn = (x - mu_ref[...]) * rs_ref[...]
    y = xn * (1.0 + g_ref[...]) + bt_ref[...]
    o_ref[...] = _activate(y, act).astype(o_ref.dtype)


# -----------------------------------------------------------------------------
# High-level ops
# -----------------------------------------------------------------------------
def instance_norm_affine(x, gamma, beta, act="none", eps=1e-5):
    """x: NHWC.  gamma/beta: (C,) shared affine or (N, C) per-batch (AdaIN)."""
    N, H, W, C = x.shape
    hw = H * W
    pack = _pack_factor(C, hw)
    Cp = pack * C
    xp = x.reshape(N, hw // pack, Cp)

    mean, rstd = _instance_mean_rstd(xp, C, pack, hw, eps)
    g = jnp.broadcast_to(jnp.asarray(gamma, jnp.float32).reshape(-1, C), (N, C))
    b = jnp.broadcast_to(jnp.asarray(beta, jnp.float32).reshape(-1, C), (N, C))
    scale = rstd * g
    shift = b - mean * scale
    out = _apply_scale_shift(xp, jnp.tile(scale, (1, pack)),
                             jnp.tile(shift, (1, pack)), act=act)
    return out.reshape(N, H, W, C)


def adain(x, audio, w, b):
    """AdaIN: Linear(audio) -> (gamma, beta); IN(x)*(1+gamma)+beta."""
    C = x.shape[-1]
    # Tiny (N, audio_dim) x (audio_dim, 2C) matmul: plain jnp.dot (pallas_call
    # fixed cost + 128-padding would dominate at this size).
    gb = jnp.dot(audio.astype(jnp.float32), w) + b[None, :]
    gamma = 1.0 + gb[:, :C]
    beta = gb[:, C:]
    return instance_norm_affine(x, gamma, beta, act="none")


def spade(x, mod, p, act="none", eps=1e-5):
    """SPADE: IN(x) * (1 + gamma(mod)) + beta(mod), tiled apply kernel."""
    h = conv2d(mod, p["w_shared"], stride=1, padding=1, act="relu")
    # gamma and beta convolutions fused into one matmul (same A matrix).
    w_gb = jnp.concatenate([p["w_gamma"], p["w_beta"]], axis=-1)
    gb = conv2d(h, w_gb, stride=1, padding=1)

    N, H, W, C = x.shape
    hw = H * W
    pack = _pack_factor(C, hw)
    Cp = pack * C
    gamma = gb[..., :C]
    beta = gb[..., C:]

    xp = x.reshape(N, hw // pack, Cp)
    gp = gamma.reshape(N, hw // pack, Cp)
    bp = beta.reshape(N, hw // pack, Cp)

    mean, rstd = _instance_mean_rstd(xp, C, pack, hw, eps)
    mu_l = jnp.tile(mean, (1, pack)).reshape(N, 1, Cp)
    rs_l = jnp.tile(rstd, (1, pack)).reshape(N, 1, Cp)

    HWp = hw // pack
    T = _spatial_tile(HWp, Cp)
    nt = HWp // T
    out = pl.pallas_call(
        functools.partial(_spade_apply_kernel, act=act),
        out_shape=jax.ShapeDtypeStruct((N, HWp, Cp), x.dtype),
        grid=(N, nt),
        in_specs=[pl.BlockSpec((1, T, Cp), lambda n, s: (n, s, 0)),
                  pl.BlockSpec((1, T, Cp), lambda n, s: (n, s, 0)),
                  pl.BlockSpec((1, T, Cp), lambda n, s: (n, s, 0)),
                  pl.BlockSpec((1, 1, Cp), lambda n, s: (n, 0, 0)),
                  pl.BlockSpec((1, 1, Cp), lambda n, s: (n, 0, 0))],
        out_specs=pl.BlockSpec((1, T, Cp), lambda n, s: (n, s, 0)),
        compiler_params=pltpu.CompilerParams(
            dimension_semantics=("parallel", "parallel"),
            vmem_limit_bytes=VMEM_LIMIT_BYTES),
    )(xp, gp, bp, mu_l, rs_l)
    return out.reshape(N, H, W, C)


def pixel_shuffle(x, r):
    """torch.nn.PixelShuffle semantics, NHWC layout."""
    # TODO(synk): fold into the preceding matmul's output layout to save a pass.
    N, H, W, C = x.shape
    Co = C // (r * r)
    x = x.reshape(N, H, W, Co, r, r)
    x = x.transpose(0, 1, 4, 2, 5, 3)
    return x.reshape(N, H * r, W * r, Co)


# -----------------------------------------------------------------------------
# Parameters (deterministic init; conv weights NHWC-style (kh, kw, Cin, Cout))
# -----------------------------------------------------------------------------
def init_params(key, audio_dim=64, spade_hidden=128):
    k = iter(jax.random.split(key, 64))

    def nrm(shape, scale=0.05):
        return scale * jax.random.normal(next(k), shape, jnp.float32)

    def spade_p(cin_mod, c):
        return {"w_shared": nrm((3, 3, cin_mod, spade_hidden)),
                "w_gamma": nrm((3, 3, spade_hidden, c)),
                "w_beta": nrm((3, 3, spade_hidden, c))}

    def adain_p(c):
        return {"w": nrm((audio_dim, 2 * c)), "b": jnp.zeros((2 * c,), jnp.float32)}

    p = {
        "conv1_w": nrm((7, 7, 9, 32)),
        "bn1_g": jnp.ones((32,), jnp.float32), "bn1_b": jnp.zeros((32,), jnp.float32),
        "conv2_w": nrm((3, 3, 32, 128)),
        "bn2_g": jnp.ones((128,), jnp.float32), "bn2_b": jnp.zeros((128,), jnp.float32),
        "conv3_w": nrm((3, 3, 128, 512)),
        "bn3_g": jnp.ones((512,), jnp.float32), "bn3_b": jnp.zeros((512,), jnp.float32),
        "spade_1": spade_p(512, 512),
        "adain_1": adain_p(512),
        "spade_2": spade_p(128, 128),
        "adain_2": adain_p(128),
        "spade_3": spade_p(32, 32),
        "adain_3": adain_p(32),
        "spade_4": spade_p(3, 32),
        "conv_last_w": nrm((7, 7, 32, 3)),
    }
    return p


# -----------------------------------------------------------------------------
# Forward pass (mirrors RenderingNetwork.forward)
# -----------------------------------------------------------------------------
def rendering_network_forward(params, input_3d_face, wrapped_image,
                              h1, h2, h3, audio_feature, spatial=64):
    def to_nhwc(t):
        return jnp.transpose(t, (0, 2, 3, 1))

    # original module hardcodes (-1, 9, 256, 256); spatial is parameterized here.
    x = input_3d_face.reshape(-1, 9, spatial, spatial)
    x = to_nhwc(x)

    # encoder: conv -> InstanceNorm(affine) -> ReLU (norm+relu fused in kernel)
    x = conv2d(x, params["conv1_w"], stride=1, padding=3)
    x = instance_norm_affine(x, params["bn1_g"], params["bn1_b"], act="relu")
    x = conv2d(x, params["conv2_w"], stride=2, padding=1)
    x = instance_norm_affine(x, params["bn2_g"], params["bn2_b"], act="relu")
    x = conv2d(x, params["conv3_w"], stride=2, padding=1)
    x = instance_norm_affine(x, params["bn3_g"], params["bn3_b"], act="relu")

    # decoder
    x = spade(x, to_nhwc(h3), params["spade_1"])
    x = adain(x, audio_feature, params["adain_1"]["w"], params["adain_1"]["b"])
    x = pixel_shuffle(x, 2)
    x = spade(x, to_nhwc(h2), params["spade_2"])
    x = adain(x, audio_feature, params["adain_2"]["w"], params["adain_2"]["b"])
    x = pixel_shuffle(x, 2)
    x = spade(x, to_nhwc(h1), params["spade_3"])
    x = adain(x, audio_feature, params["adain_3"]["w"], params["adain_3"]["b"])
    # spade_4 with LeakyReLU fused into the SPADE apply kernel epilogue
    x = spade(x, to_nhwc(wrapped_image), params["spade_4"], act="leaky")

    # final 7x7 conv with fused tanh in the matmul epilogue
    x = conv2d(x, params["conv_last_w"], stride=1, padding=3, act="tanh")
    return jnp.transpose(x, (0, 3, 1, 2))   # back to NCHW like torch


# -----------------------------------------------------------------------------
if __name__ == "__main__":
    N = 2
    S = 64          # small stand-in for the module's 256x256 spatial size
    AUDIO_DIM = 64

    key = jax.random.PRNGKey(0)
    kp, k1, k2, k3, k4, k5, k6 = jax.random.split(key, 7)

    params = init_params(kp, audio_dim=AUDIO_DIM)

    input_3d_face = jax.random.normal(k1, (N, 9, S, S), jnp.float32)
    wrapped_image = jax.random.normal(k2, (N, 3, S, S), jnp.float32)
    h1 = jax.random.normal(k3, (N, 32, S, S), jnp.float32)
    h2 = jax.random.normal(k4, (N, 128, S // 2, S // 2), jnp.float32)
    h3 = jax.random.normal(k5, (N, 512, S // 4, S // 4), jnp.float32)
    audio_feature = jax.random.normal(k6, (N, AUDIO_DIM), jnp.float32)

    out = rendering_network_forward(params, input_3d_face, wrapped_image,
                                    h1, h2, h3, audio_feature, spatial=S)
    out = jax.block_until_ready(out)
    assert out.shape == (N, 3, S, S), out.shape
    assert bool(jnp.all(jnp.isfinite(out)))
    print("KERNEL_OK")
</pallas_src>

<mosaic_0001>
module attributes {stable_mosaic.version = 11 : i64} {
  func.func @_matmul_kernel(%arg0: i32, %arg1: i32, %arg2: i32, %arg3: memref<512x512xbf16, #tpu.memory_space<vmem>>, %arg4: memref<512x128xbf16, #tpu.memory_space<vmem>>, %arg5: memref<512x128xf32, #tpu.memory_space<vmem>>) attributes {dimension_semantics = [#tpu.dimension_semantics<parallel>, #tpu.dimension_semantics<parallel>, #tpu.dimension_semantics<arbitrary>], iteration_bounds = array<i64: 1, 16, 1>, scalar_prefetch = 0 : i64, scratch_operands = 0 : i64, tpu.core_type = #tpu.core_type<tc>, window_params = [{transform_indices = @transform_0, window_bounds = array<i64: 512, 512>}, {transform_indices = @transform_1, window_bounds = array<i64: 512, 128>}, {transform_indices = @transform_2, window_bounds = array<i64: 512, 128>}]} {
    %c0 = arith.constant 0 : index
    %c0_0 = arith.constant 0 : index
    %0 = vector.load %arg3[%c0, %c0_0] : memref<512x512xbf16, #tpu.memory_space<vmem>>, vector<512x512xbf16>
    %c0_1 = arith.constant 0 : index
    %c0_2 = arith.constant 0 : index
    %1 = vector.load %arg4[%c0_1, %c0_2] : memref<512x128xbf16, #tpu.memory_space<vmem>>, vector<512x128xbf16>
    %cst = arith.constant dense<0.000000e+00> : vector<512x128xf32>
    %2 = tpu.matmul %0, %1, %cst {dimension_numbers = #tpu.dot_dimension_numbers<[1], [0], [0], [1], [0, 0, 1, 1], [], []>} : vector<512x512xbf16>, vector<512x128xbf16>, vector<512x128xf32> -> vector<512x128xf32>
    %c0_3 = arith.constant 0 : index
    %c0_4 = arith.constant 0 : index
    %3 = vector.load %arg5[%c0_3, %c0_4] : memref<512x128xf32, #tpu.memory_space<vmem>>, vector<512x128xf32>
    tpu.vector_store %arg5[%c0_3, %c0_4], %2 {strides = array<i32>} : memref<512x128xf32, #tpu.memory_space<vmem>>, vector<512x128xf32>,
    return
  }
  func.func @transform_0(%arg0: i32, %arg1: i32, %arg2: i32) -> (i32, i32) {
    %c0_i32 = arith.constant 0 : i32
    return %arg1, %arg2 : i32, i32
  }
  func.func @transform_1(%arg0: i32, %arg1: i32, %arg2: i32) -> (i32, i32) {
    %c0_i32 = arith.constant 0 : i32
    return %arg2, %arg0 : i32, i32
  }
  func.func @transform_2(%arg0: i32, %arg1: i32, %arg2: i32) -> (i32, i32) {
    %c0_i32 = arith.constant 0 : i32
    return %arg1, %arg0 : i32, i32
  }
}

</mosaic_0001>

<bundles_post_ra>
// kernel: tpu_custom_call.1
= control target key start
LH: loop header
LB: loop body
LE: loop exit
PB: predicated region body
PF: predicated region fallthrough
CT: control target
= control target key end

     0   :  { %7 = vsyncpa [#allocation3], 0  ;;  %s3649_s0 = inlined_call_operand.hbm [shape: bf16[8192,512], index: 0, kind: input, shape index: {}]   ;;  %s3650_s1 = inlined_call_operand.hbm [shape: bf16[512,128], index: 1, kind: input, shape index: {}]   ;;  %s3651_s2 = inlined_call_operand.hbm [shape: f32[8192,128], index: 2, kind: output, shape index: {}]  }
   0x1   :  { %9 = vsyncpa [#allocation3 + $0x1], 0 }
   0x2   :  { %10 = vsyncpa [#allocation6], 0 }
   0x3   :  { %11 = vsyncpa [#allocation4], 0 }
   0x4   :  { %13 = vsyncpa [#allocation4 + $0x1], 0  ;;  %s3176_s9 = smov 0   ;;  %s3178_s10 = smov 0  }
   0x5   :  { %s3180_s11 = smov 0   ;;  %s3182_s12 = smov 0  }
   0x6   :  { %s3184_s13 = smov 0   ;;  %s3186_s14 = smov 0  }
   0x7 LB: > { %s2106_s15 = sadd.s32 4294967295, %s3152_s14   ;;  %s2107_s16 = sadd.s32 4294967294, %s3152_s14   ;;  %s3152_s14 = sphi %s3186_s14, %s19_s14   ;;  %s3148_s13 = sphi %s3184_s13, %s3663_s13   ;;  %s3144_s12 = sphi %s3182_s12, %s3662_s12   ;;  %s3140_s11 = sphi %s3180_s11, %s3661_s11   ;;  %s3136_s10 = sphi %s3178_s10, %s3660_s10   ;;  %s3132_s9 = sphi %s3176_s9, %s3659_s9  }
   0x8   : > { %p60_p0 = scmp.ne.s32.totalorder %s3136_s10, %s3132_s9  ;;  %p3210_p1 = scmp.eq.s32.totalorder %s2106_s15, 0 }
   0x9   : > { %p3214_p2 = scmp.eq.s32.totalorder %s2106_s15, 15  ;;  %p120_p3 = scmp.eq.s32.totalorder %s2107_s16, 15 }
   0xa   : > { %p3220_p4 = por %p3210_p1, %p60_p0  ;;  %p2108_p5 = scmp.ge.s32.totalorder %s3152_s14, 1 }
   0xb   : > { %p3225_p6 = por %p120_p3, %p60_p0  ;;  %p127_p7 = scmp.lt.s32.totalorder %s3152_s14, 17 }
   0xc   : > { %s142_s23 = sshll.u32 %s3650_s1, 4  ;;  %s3154_s25 = smov [#allocation5]   ;;  %s143_s23 = int_to_ptr.hbm [resolvable:$true] %s142_s23 }
   0xd   : > { %p3233_p8 = pnand %p2108_p5, %p127_p7  ;;  %s144_s26 = sshll.u32 %s3154_s25, 4  ;;  %s145_s26 = int_to_ptr.vmem [resolvable:$true] %s144_s26 }
   0xe   : > { %s3155_s27 = smov 64   ;;  %s3156_s28 = smov 4  }
   0xf   : > { %p2935_p9 = pneg %p3233_p8  ;;  %s34_s29 = sadd.s32 1, %s3148_s13 }
  0x10   : > { %p36_p11 = scmp.ge.s32.totalorder %s34_s29, 16  ;;  %s47_s30 = sadd.s32 1, %s3140_s11 }
  0x11   : > { %p2936_p10 = pnand %p2935_p9, %p3210_p1  ;;  %p54_p12 = scmp.ne.s32.totalorder %s3140_s11, %s3136_s10 }
  0x12   : > { %p55_p13 = scmp.eq.s32.totalorder %s3152_s14, 0  ;;  %s3665_s29 = smov (%p36_p11, %s34_s29), 0 }
  0x13   : > { %2938 = dma.hbm_to_vmem [thread:$0]  (!%p2936_p10), %s143_s23, 4096, %s145_s26, [#allocation6], %s3155_s27, %s3155_s27, %s3156_s28  }
  0x14   : > { %p3248_p0 = por %p55_p13, %p54_p12  ;;  %p3254_p3 = por %p3214_p2, %p54_p12 }
  0x15   : > { %s42_s5 = ssub.s32 %s3148_s13, %s3665_s29  ;;  %p2948_p5 = scmp.lt.s32.totalorder %s3152_s14, 16 }
  0x16   : > { %p45_p7 = scmp.eq.s32.totalorder %s42_s5, 0  ;;  %s158_s6 = sand.u32 1, %s3140_s11  }
  0x17   : > { %s2111_s7 = sshll.u32 %s158_s6, 10  ;;  %s2765_s15 = sshll.u32 %s3148_s13, 10 }
  0x18   : > { %s3263_s8 = scalar_select %p45_p7, %s3140_s11, %s47_s30  }
  0x19   : > { %s170_s22 = scalar_lea.hbm %s3649_s0, %s2765_s15  ;;  %s162_s23 = scalar_lea.vmem [#allocation2], %s2111_s7 }
  0x1a   : > { %s173_s25 = sshll.u32 %s162_s23, 4  ;;  %s171_s18 = sshll.u32 %s170_s22, 4  ;;  %s174_s25 = int_to_ptr.vmem [resolvable:$true] %s173_s25  ;;  %s172_s18 = int_to_ptr.hbm [resolvable:$true] %s171_s18 }
  0x1b   : > { %p2940_p2 = pnand %p2948_p5, %p3248_p0  ;;  %s159_s26 = scalar_lea.sflag [#allocation3], %s158_s6 }
  0x1c   : > { %s3157_s27 = smov 256   ;;  %s3158_s28 = smov 16  }
  0x1d   : > { %2942 = dma.hbm_to_vmem [thread:$0]  (!%p2940_p2), %s172_s18, 16384, %s174_s25, %s159_s26, %s3157_s27, %s3157_s27, %s3158_s28  }
  0x1e   : > { %185 = sbr.rel (%p3233_p8) target bundleno = 716 (0x2cc), region = 28  ;;  %s3274_s30 = sand.u32 (!%p3233_p8), 1, %s3136_s10  }
  0x1f   : > { %s2116_s5 = sshll.u32 (!%p3233_p8), %s3274_s30, 10  ;;  %s188_s7 = scalar_lea.sflag (!%p3233_p8), [#allocation3], %s3274_s30 }
  0x20   : > { %s3278_s15 = scalar_lea.vmem (!%p3233_p8), [#allocation2], %s2116_s5 }
  0x23   : > { %3119 = dma.done.wait (%p3220_p4), %s188_s7, 16384  }
  0x24   : > { %3121 = vsyncadd (%p3220_p4), %s188_s7, 4294950912 }
  0x25   : > { %3123 = dma.done.wait (%p3210_p1), [#allocation6], 4096  }
  0x26   : > { %3125 = vsyncadd (%p3210_p1), [#allocation6], 4294963200  ;;  %v2901_v0 = vld [vmem:[#allocation5 + $0x38] sm:$0xff]  ;;  %v2900_v4 = vld [vmem:[#allocation5 + $0x30] sm:$0xff]  ;;  %s2118_s17 = sshll.u32 %s3274_s30, 9  ;;  %s2926_s24 = sshll.u32 %s3144_s12, 9 }
  0x27   : > { %v2909_v1 = vld [vmem:[#allocation5 + $0x78] sm:$0xff]  ;;  %1246 = vmatpush.bf16.msra.mxu0 %v2901_v0  ;;  %v2908_v5 = vld [vmem:[#allocation5 + $0x70] sm:$0xff]  ;;  %v2899_v8 = vld [vmem:[#allocation5 + $0x28] sm:$0xff]  ;;  %s3363_s19 = scalar_lea.vmem [#allocation7], %s2118_s17  ;;  %s1999_s16 = scalar_lea.hbm %s3651_s2, %s2926_s24 }
  0x28   : > { %v2917_v2 = vld [vmem:[#allocation5 + $0xb8] sm:$0xff]  ;;  %1415 = vmatpush.bf16.msra.mxu1 %v2909_v1  ;;  %v2916_v6 = vld [vmem:[#allocation5 + $0xb0] sm:$0xff]  ;;  %v2907_v9 = vld [vmem:[#allocation5 + $0x68] sm:$0xff]  ;;  %s2000_s21 = sshll.u32 %s3363_s19, 4  ;;  %s2002_s22 = sshll.u32 %s1999_s16, 4  ;;  %s2001_s21 = int_to_ptr.vmem [resolvable:$true] %s2000_s21  ;;  %s2003_s22 = int_to_ptr.hbm [resolvable:$true] %s2002_s22 }
  0x29   : > { %v2925_v3 = vld [vmem:[#allocation5 + $0xf8] sm:$0xff]  ;;  %1584 = vmatpush.bf16.msra.mxu2 %v2917_v2  ;;  %v2924_v7 = vld [vmem:[#allocation5 + $0xf0] sm:$0xff]  ;;  %v2915_v10 = vld [vmem:[#allocation5 + $0xa8] sm:$0xff]  ;;  %s1987_s12 = scalar_lea.sflag [#allocation4], %s3274_s30  ;;  %s3080_s23 = sshra.s32 %s2003_s22, 4  ;;  %s3081_s23 = int_to_ptr.hbm [resolvable:$true] %s3080_s23 }
  0x2a   : > { %1753 = vmatpush.bf16.msra.mxu3 %v2925_v3  ;;  %v2923_v11 = vld [vmem:[#allocation5 + $0xe8] sm:$0xff]  ;;  %v2898_v12 = vld [vmem:[#allocation5 + $0x20] sm:$0xff]  ;;  %v2897_v16 = vld [vmem:[#allocation5 + $0x18] sm:$0xff]  ;;  %s3082_s25 = scalar_lea.hbm %s3081_s23, 512  ;;  %s3086_s27 = scalar_lea.hbm %s3651_s2, 8192 }
  0x2b   : > { %1247 = vmatpush.bf16.msra.mxu0 %v2900_v4  ;;  %v2906_v13 = vld [vmem:[#allocation5 + $0x60] sm:$0xff]  ;;  %v2905_v17 = vld [vmem:[#allocation5 + $0x58] sm:$0xff]  ;;  %v2896_v20 = vld [vmem:[#allocation5 + $0x10] sm:$0xff]  ;;  %p3083_p1 = scmp.ne.s32.totalorder %s3081_s23, %s3082_s25  ;;  %p3087_p9 = scmp.lt.s32.totalorder %s3081_s23, %s3651_s2 }
  0x2c   : > { %1416 = vmatpush.bf16.msra.mxu1 %v2908_v5  ;;  %v2914_v14 = vld [vmem:[#allocation5 + $0xa0] sm:$0xff]  ;;  %v2913_v18 = vld [vmem:[#allocation5 + $0x98] sm:$0xff]  ;;  %v2904_v21 = vld [vmem:[#allocation5 + $0x50] sm:$0xff]  ;;  %p3088_p10 = scmp.lt.s32.totalorder %s3086_s27, %s3082_s25 }
  0x2d   : > { %1585 = vmatpush.bf16.msra.mxu2 %v2916_v6  ;;  %v2922_v15 = vld [vmem:[#allocation5 + $0xe0] sm:$0xff]  ;;  %v2921_v19 = vld [vmem:[#allocation5 + $0xd8] sm:$0xff]  ;;  %v2912_v22 = vld [vmem:[#allocation5 + $0x90] sm:$0xff]  ;;  %p3084_p4 = pnand %p3083_p1, %p3254_p3 }
  0x2e   : > { %1754 = vmatpush.bf16.msra.mxu3 %v2924_v7  ;;  %v2920_v23 = vld [vmem:[#allocation5 + $0xd0] sm:$0xff]  ;;  %v2895_v24 = vld [vmem:[#allocation5 + $0x8] sm:$0xff]  ;;  %v2894_v28 = vld [vmem:[#allocation5] sm:$0xff]  ;;  %p3089_p11 = por %p3088_p10, %p3087_p9 }
  0x2f   : > { %1248 = vmatpush.bf16.msra.mxu0 %v2899_v8  ;;  %v2903_v25 = vld [vmem:[#allocation5 + $0x48] sm:$0xff]  ;;  %v2902_v29 = vld [vmem:[#allocation5 + $0x40] sm:$0xff]  ;;  %v2768_v33 = vld [vmem:[%s3278_s15 + $0xc] sm:$0xf0]  ;;  %p3085_p8 = pneg %p3084_p4 }
  0x30   : > { %1417 = vmatpush.bf16.msra.mxu1 %v2907_v9  ;;  %v2911_v26 = vld [vmem:[#allocation5 + $0x88] sm:$0xff]  ;;  %v2910_v30 = vld [vmem:[#allocation5 + $0x80] sm:$0xff]  ;;  %v2123_v35 = vld [vmem:[%s3278_s15 + $0x10] sm:$0xf0] }
  0x31   : > { %1586 = vmatpush.bf16.msra.mxu2 %v2915_v10  ;;  %v2919_v27 = vld [vmem:[#allocation5 + $0xc8] sm:$0xff]  ;;  %v2918_v31 = vld [vmem:[#allocation5 + $0xc0] sm:$0xff]  ;;  %v2769_v37 = vld [vmem:[%s3278_s15 + $0x14] sm:$0xf0]  ;;  %p3090_p12 = pnand %p3089_p11, %p3085_p8 }
  0x32   : > { %1755 = vmatpush.bf16.msra.mxu3 %v2923_v11  ;;  %v2121_v32 = vld [vmem:[%s3278_s15] sm:$0xf]  ;;  %v2766_v34 = vld [vmem:[%s3278_s15 + $0x4] sm:$0xf]  ;;  %v2129_v36 = vld [vmem:[%s3278_s15 + $0x8] sm:$0xf] }
  0x33   : > { %1249 = vmatpush.bf16.msra.mxu0 %v2898_v12  ;;  %v2767_v38 = vld [vmem:[%s3278_s15 + $0xc] sm:$0xf]  ;;  %v2131_v39 = vld [vmem:[%s3278_s15 + $0x18] sm:$0xf0]  ;;  %v2122_v40 = vor.u32 %v2768_v33, %v2121_v32  ;;  %v2126_v41 = vor.u32 %v2766_v34, %v2123_v35  ;;  %v2130_v42 = vor.u32 %v2769_v37, %v2129_v36  ;;  %v2137_v44 = vld [vmem:[%s3278_s15 + $0x20] sm:$0xf] }
  0x34   : > { %1418 = vmatpush.bf16.msra.mxu1 %v2906_v13  ;;  %v2134_v43 = vor.u32 %v2767_v38, %v2131_v39  ;;  %v2772_v45 = vld [vmem:[%s3278_s15 + $0x2c] sm:$0xf0]  ;;  %v2770_v46 = vld [vmem:[%s3278_s15 + $0x24] sm:$0xf]  ;;  %v2139_v47 = vld [vmem:[%s3278_s15 + $0x30] sm:$0xf0] }
  0x35   : > { %1587 = vmatpush.bf16.msra.mxu2 %v2914_v14  ;;  %v2145_v48 = vld [vmem:[%s3278_s15 + $0x28] sm:$0xf]  ;;  %v2773_v49 = vld [vmem:[%s3278_s15 + $0x34] sm:$0xf0]  ;;  %v2771_v50 = vld [vmem:[%s3278_s15 + $0x2c] sm:$0xf]  ;;  %v2138_v52 = vor.u32 %v2772_v45, %v2137_v44  ;;  %v2142_v53 = vor.u32 %v2770_v46, %v2139_v47 }
  0x36   : > { %1756 = vmatpush.bf16.msra.mxu3 %v2922_v15  ;;  %v2147_v51 = vld [vmem:[%s3278_s15 + $0x38] sm:$0xf0]  ;;  %v2146_v54 = vor.u32 %v2773_v49, %v2145_v48  ;;  %v2153_v56 = vld [vmem:[%s3278_s15 + $0x40] sm:$0xf]  ;;  %v2776_v57 = vld [vmem:[%s3278_s15 + $0x4c] sm:$0xf0] }
  0x37   : > { %1250 = vmatpush.bf16.msra.mxu0 %v2897_v16  ;;  %v2150_v55 = vor.u32 %v2771_v50, %v2147_v51  ;;  %v2774_v58 = vld [vmem:[%s3278_s15 + $0x44] sm:$0xf]  ;;  %v2155_v59 = vld [vmem:[%s3278_s15 + $0x50] sm:$0xf0]  ;;  %v2161_v60 = vld [vmem:[%s3278_s15 + $0x48] sm:$0xf]  ;;  %v2154_v0 = vor.u32 %v2776_v57, %v2153_v56 }
  0x38   : > { %1419 = vmatpush.bf16.msra.mxu1 %v2905_v17  ;;  %v2777_v61 = vld [vmem:[%s3278_s15 + $0x54] sm:$0xf0]  ;;  %v2775_v62 = vld [vmem:[%s3278_s15 + $0x4c] sm:$0xf]  ;;  %v2163_v63 = vld [vmem:[%s3278_s15 + $0x58] sm:$0xf0]  ;;  %v2158_v1 = vor.u32 %v2774_v58, %v2155_v59 }
  0x39   : > { %1588 = vmatpush.bf16.msra.mxu2 %v2913_v18  ;;  %v2162_v2 = vor.u32 %v2777_v61, %v2161_v60  ;;  %v2166_v3 = vor.u32 %v2775_v62, %v2163_v63  ;;  %v2169_v4 = vld [vmem:[%s3278_s15 + $0x60] sm:$0xf]  ;;  %v2780_v5 = vld [vmem:[%s3278_s15 + $0x6c] sm:$0xf0]  ;;  %v2778_v6 = vld [vmem:[%s3278_s15 + $0x64] sm:$0xf] }
  0x3a   : > { %1757 = vmatpush.bf16.msra.mxu3 %v2921_v19  ;;  %v2171_v7 = vld [vmem:[%s3278_s15 + $0x70] sm:$0xf0]  ;;  %v2177_v8 = vld [vmem:[%s3278_s15 + $0x68] sm:$0xf]  ;;  %v2781_v9 = vld [vmem:[%s3278_s15 + $0x74] sm:$0xf0]  ;;  %v2170_v12 = vor.u32 %v2780_v5, %v2169_v4 }
  0x3b   : > { %1251 = vmatpush.bf16.msra.mxu0 %v2896_v20  ;;  %v2779_v10 = vld [vmem:[%s3278_s15 + $0x6c] sm:$0xf]  ;;  %v2179_v11 = vld [vmem:[%s3278_s15 + $0x78] sm:$0xf0]  ;;  %v2174_v13 = vor.u32 %v2778_v6, %v2171_v7  ;;  %v2178_v14 = vor.u32 %v2781_v9, %v2177_v8  ;;  %v2185_v16 = vld [vmem:[%s3278_s15 + $0x80] sm:$0xf] }
  0x3c   : > { %1420 = vmatpush.bf16.msra.mxu1 %v2904_v21  ;;  %v2182_v15 = vor.u32 %v2779_v10, %v2179_v11  ;;  %v2784_v17 = vld [vmem:[%s3278_s15 + $0x8c] sm:$0xf0]  ;;  %v2782_v18 = vld [vmem:[%s3278_s15 + $0x84] sm:$0xf]  ;;  %v2187_v19 = vld [vmem:[%s3278_s15 + $0x90] sm:$0xf0] }
  0x3d   : > { %1589 = vmatpush.bf16.msra.mxu2 %v2912_v22  ;;  %v2193_v20 = vld [vmem:[%s3278_s15 + $0x88] sm:$0xf]  ;;  %v2785_v21 = vld [vmem:[%s3278_s15 + $0x94] sm:$0xf0]  ;;  %v2783_v22 = vld [vmem:[%s3278_s15 + $0x8c] sm:$0xf] }
  0x3e   : > { %1758 = vmatpush.bf16.msra.mxu3 %v2920_v23  ;;  %v2195_v23 = vld [vmem:[%s3278_s15 + $0x98] sm:$0xf0]  ;;  %v2209_v32 = vld [vmem:[%s3278_s15 + $0xa8] sm:$0xf]  ;;  %v2789_v33 = vld [vmem:[%s3278_s15 + $0xb4] sm:$0xf0] }
  0x3f   : > { %1252 = vmatpush.bf16.msra.mxu0 %v2895_v24  ;;  %v2186_v24 = vor.u32 %v2784_v17, %v2185_v16  ;;  %v2787_v34 = vld [vmem:[%s3278_s15 + $0xac] sm:$0xf]  ;;  %v2211_v35 = vld [vmem:[%s3278_s15 + $0xb8] sm:$0xf0]  ;;  %v2210_v38 = vor.u32 %v2789_v33, %v2209_v32  ;;  %v2225_v44 = vld [vmem:[%s3278_s15 + $0xc8] sm:$0xf] }
  0x40   : > { %1421 = vmatpush.bf16.msra.mxu1 %v2903_v25  ;;  %v2190_v25 = vor.u32 %v2782_v18, %v2187_v19  ;;  %v2214_v39 = vor.u32 %v2787_v34, %v2211_v35  ;;  %v2793_v45 = vld [vmem:[%s3278_s15 + $0xd4] sm:$0xf0]  ;;  %v2791_v46 = vld [vmem:[%s3278_s15 + $0xcc] sm:$0xf]  ;;  %v2227_v47 = vld [vmem:[%s3278_s15 + $0xd8] sm:$0xf0] }
  0x41   : > { %1590 = vmatpush.bf16.msra.mxu2 %v2911_v26  ;;  %v2194_v26 = vor.u32 %v2785_v21, %v2193_v20  ;;  %v2226_v50 = vor.u32 %v2793_v45, %v2225_v44  ;;  %v2230_v51 = vor.u32 %v2791_v46, %v2227_v47  ;;  %v2241_v56 = vld [vmem:[%s3278_s15 + $0xe8] sm:$0xf]  ;;  %v2797_v57 = vld [vmem:[%s3278_s15 + $0xf4] sm:$0xf0]  ;;  %v2795_v58 = vld [vmem:[%s3278_s15 + $0xec] sm:$0xf] }
  0x42   : > { %1759 = vmatpush.bf16.msra.mxu3 %v2919_v27  ;;  %v2198_v27 = vor.u32 %v2783_v22, %v2195_v23  ;;  %v2243_v59 = vld [vmem:[%s3278_s15 + $0xf8] sm:$0xf0]  ;;  %v2242_v62 = vor.u32 %v2797_v57, %v2241_v56  ;;  %v2257_v4 = vld [vmem:[%s3278_s15 + $0x108] sm:$0xf]  ;;  %v2801_v5 = vld [vmem:[%s3278_s15 + $0x114] sm:$0xf0] }
  0x43   : > { %1253 = vmatpush.bf16.msra.mxu0 %v2894_v28  ;;  %v2201_v28 = vld [vmem:[%s3278_s15 + $0xa0] sm:$0xf]  ;;  %v2246_v63 = vor.u32 %v2795_v58, %v2243_v59  ;;  %v2799_v6 = vld [vmem:[%s3278_s15 + $0x10c] sm:$0xf]  ;;  %v2259_v7 = vld [vmem:[%s3278_s15 + $0x118] sm:$0xf0] }
  0x44   : > { %1422 = vmatpush.bf16.msra.mxu1 %v2902_v29  ;;  %v2788_v29 = vld [vmem:[%s3278_s15 + $0xac] sm:$0xf0]  ;;  %v2265_v21 = vld [vmem:[%s3278_s15 + $0x120] sm:$0xf]  ;;  %v2802_v23 = vld [vmem:[%s3278_s15 + $0x124] sm:$0xf] }
  0x45   : > { %1591 = vmatpush.bf16.msra.mxu2 %v2910_v30  ;;  %v2786_v30 = vld [vmem:[%s3278_s15 + $0xa4] sm:$0xf]  ;;  %v2202_v36 = vor.u32 %v2788_v29, %v2201_v28  ;;  %v2804_v22 = vld [vmem:[%s3278_s15 + $0x12c] sm:$0xf0]  ;;  %v2275_v28 = vld [vmem:[%s3278_s15 + $0x138] sm:$0xf0] }
  0x46   : > { %1760 = vmatpush.bf16.msra.mxu3 %v2918_v31  ;;  %1254 = vmatmul.bf16.vlgmr.msra.gmra.mxu0 %v2122_v40  ;;  %v2203_v31 = vld [vmem:[%s3278_s15 + $0xb0] sm:$0xf0]  ;;  %v2217_v40 = vld [vmem:[%s3278_s15 + $0xc0] sm:$0xf]  ;;  %v2266_v32 = vor.u32 %v2804_v22, %v2265_v21 }
  0x47   : > { %1423 = vmatmul.bf16.vlgmr.msra.gmra.mxu1 %v2126_v41  ;;  %v2206_v37 = vor.u32 %v2786_v30, %v2203_v31  ;;  %v2792_v41 = vld [vmem:[%s3278_s15 + $0xcc] sm:$0xf0]  ;;  %v2281_v47 = vld [vmem:[%s3278_s15 + $0x140] sm:$0xf] }
  0x48   : > { %1592 = vmatmul.bf16.vlgmr.msra.gmra.mxu2 %v2130_v42  ;;  %v2790_v42 = vld [vmem:[%s3278_s15 + $0xc4] sm:$0xf]  ;;  %v2218_v48 = vor.u32 %v2792_v41, %v2217_v40 }
  0x49   : > { %1761 = vmatmul.bf16.vlgmr.msra.gmra.mxu3 %v2134_v43  ;;  %v2219_v43 = vld [vmem:[%s3278_s15 + $0xd0] sm:$0xf0] }
  0x4a   : > { %v2222_v49 = vor.u32 %v2790_v42, %v2219_v43 }
  0x56   : > { %1259 = vmatmul.bf16.gmra.mxu0 %v2138_v52  ;;  %v2233_v52 = vld [vmem:[%s3278_s15 + $0xe0] sm:$0xf] }
  0x57   : > { %1428 = vmatmul.bf16.gmra.mxu1 %v2142_v53  ;;  %v2796_v53 = vld [vmem:[%s3278_s15 + $0xec] sm:$0xf0] }
  0x58   : > { %1597 = vmatmul.bf16.gmra.mxu2 %v2146_v54  ;;  %v2794_v54 = vld [vmem:[%s3278_s15 + $0xe4] sm:$0xf]  ;;  %v2234_v60 = vor.u32 %v2796_v53, %v2233_v52  ;;  %v2809_v52 = vld [vmem:[%s3278_s15 + $0x154] sm:$0xf0]  ;;  %v2807_v53 = vld [vmem:[%s3278_s15 + $0x14c] sm:$0xf] }
  0x59   : > { %1766 = vmatmul.bf16.gmra.mxu3 %v2150_v55  ;;  %v2235_v55 = vld [vmem:[%s3278_s15 + $0xf0] sm:$0xf0] }
  0x5a   : > { %v2238_v61 = vor.u32 %v2794_v54, %v2235_v55  ;;  %v2291_v54 = vld [vmem:[%s3278_s15 + $0x158] sm:$0xf0] }
  0x66   : > { %1264 = vmatmul.bf16.gmra.mxu0 %v2154_v0  ;;  %v2249_v0 = vld [vmem:[%s3278_s15 + $0x100] sm:$0xf] }
  0x67   : > { %1433 = vmatmul.bf16.gmra.mxu1 %v2158_v1  ;;  %v2800_v1 = vld [vmem:[%s3278_s15 + $0x10c] sm:$0xf0] }
  0x68   : > { %1602 = vmatmul.bf16.gmra.mxu2 %v2162_v2  ;;  %v2798_v2 = vld [vmem:[%s3278_s15 + $0x104] sm:$0xf]  ;;  %v2250_v8 = vor.u32 %v2800_v1, %v2249_v0  ;;  %v2294_v0 = vor.u32 %v2807_v53, %v2291_v54 }
  0x69   : > { %1771 = vmatmul.bf16.gmra.mxu3 %v2166_v3  ;;  %v2251_v3 = vld [vmem:[%s3278_s15 + $0x110] sm:$0xf0] }
  0x6a   : > { %v2254_v9 = vor.u32 %v2798_v2, %v2251_v3 }
  0x76   : > { %1269 = vmatmul.bf16.gmra.mxu0 %v2170_v12  ;;  %v2258_v12 = vor.u32 %v2801_v5, %v2257_v4 }
  0x77   : > { %1438 = vmatmul.bf16.gmra.mxu1 %v2174_v13  ;;  %v2262_v13 = vor.u32 %v2799_v6, %v2259_v7 }
  0x78   : > { %1607 = vmatmul.bf16.gmra.mxu2 %v2178_v14 }
  0x79   : > { %1776 = vmatmul.bf16.gmra.mxu3 %v2182_v15 }
  0x86   : > { %1274 = vmatmul.bf16.gmra.mxu0 %v2186_v24  ;;  %v2267_v24 = vld [vmem:[%s3278_s15 + $0x130] sm:$0xf0] }
  0x87   : > { %1443 = vmatmul.bf16.gmra.mxu1 %v2190_v25  ;;  %v2273_v25 = vld [vmem:[%s3278_s15 + $0x128] sm:$0xf]  ;;  %v2270_v33 = vor.u32 %v2802_v23, %v2267_v24 }
  0x88   : > { %1612 = vmatmul.bf16.gmra.mxu2 %v2194_v26  ;;  %v2805_v26 = vld [vmem:[%s3278_s15 + $0x134] sm:$0xf0] }
  0x89   : > { %1781 = vmatmul.bf16.gmra.mxu3 %v2198_v27  ;;  %v2803_v27 = vld [vmem:[%s3278_s15 + $0x12c] sm:$0xf] }
  0x96   : > { %1279 = vmatmul.bf16.gmra.mxu0 %v2202_v36 }
  0x97   : > { %1448 = vmatmul.bf16.gmra.mxu1 %v2206_v37  ;;  %v2274_v37 = vor.u32 %v2805_v26, %v2273_v25 }
  0x98   : > { %1617 = vmatmul.bf16.gmra.mxu2 %v2210_v38  ;;  %v2278_v38 = vor.u32 %v2803_v27, %v2275_v28 }
  0x99   : > { %1786 = vmatmul.bf16.gmra.mxu3 %v2214_v39 }
  0xa6   : > { %1284 = vmatmul.bf16.gmra.mxu0 %v2218_v48  ;;  %v2808_v48 = vld [vmem:[%s3278_s15 + $0x14c] sm:$0xf0] }
  0xa7   : > { %1453 = vmatmul.bf16.gmra.mxu1 %v2222_v49  ;;  %v2806_v49 = vld [vmem:[%s3278_s15 + $0x144] sm:$0xf]  ;;  %v2282_v58 = vor.u32 %v2808_v48, %v2281_v47 }
  0xa8   : > { %1622 = vmatmul.bf16.gmra.mxu2 %v2226_v50  ;;  %v2283_v50 = vld [vmem:[%s3278_s15 + $0x150] sm:$0xf0] }
  0xa9   : > { %1791 = vmatmul.bf16.gmra.mxu3 %v2230_v51  ;;  %v2289_v51 = vld [vmem:[%s3278_s15 + $0x148] sm:$0xf]  ;;  %v2286_v59 = vor.u32 %v2806_v49, %v2283_v50 }
  0xb6   : > { %1289 = vmatmul.bf16.gmra.mxu0 %v2234_v60 }
  0xb7   : > { %1458 = vmatmul.bf16.gmra.mxu1 %v2238_v61 }
  0xb8   : > { %1627 = vmatmul.bf16.gmra.mxu2 %v2242_v62 }
  0xb9   : > { %1796 = vmatmul.bf16.gmra.mxu3 %v2246_v63  ;;  %v2290_v63 = vor.u32 %v2809_v52, %v2289_v51 }
  0xc3   : > { %v1255_v10 = vpop.f32.mrf.mxu0 }
  0xc4   : > { %v1424_v11 = vpop.f32.mrf.mxu1 }
  0xc5   : > { %v1425_v14 = vadd.f32 %v1424_v11, %v1255_v10  ;;  %v2812_v10 = vld [vmem:[%s3278_s15 + $0x16c] sm:$0xf0]  ;;  %v2810_v11 = vld [vmem:[%s3278_s15 + $0x164] sm:$0xf] }
  0xc6   : > { %1294 = vmatmul.bf16.gmra.mxu0 %v2250_v8 }
  0xc7   : > { %1463 = vmatmul.bf16.gmra.mxu1 %v2254_v9  ;;  %v2297_v9 = vld [vmem:[%s3278_s15 + $0x160] sm:$0xf] }
  0xc8   : > { %1632 = vmatmul.bf16.gmra.mxu2 %v2258_v12  ;;  %v2299_v12 = vld [vmem:[%s3278_s15 + $0x170] sm:$0xf0] }
  0xc9   : > { %1801 = vmatmul.bf16.gmra.mxu3 %v2262_v13  ;;  %v2305_v13 = vld [vmem:[%s3278_s15 + $0x168] sm:$0xf]  ;;  %v2302_v21 = vor.u32 %v2810_v11, %v2299_v12 }
  0xcb   : > { %v1593_v15 = vpop.f32.mrf.mxu2  ;;  %v1257_v18 = vpop.f32.mrf.mxu0 }
  0xcc   : > { %v1762_v16 = vpop.f32.mrf.mxu3  ;;  %v1594_v17 = vadd.f32 %v1593_v15, %v1425_v14  ;;  %v1426_v19 = vpop.f32.mrf.mxu1  ;;  %v2813_v14 = vld [vmem:[%s3278_s15 + $0x174] sm:$0xf0]  ;;  %v2811_v15 = vld [vmem:[%s3278_s15 + $0x16c] sm:$0xf] }
  0xcd   : > { %v1427_v29 = vadd.f32 %v1426_v19, %v1257_v18  ;;  %v2306_v25 = vor.u32 %v2813_v14, %v2305_v13 }
  0xce   : > { %v1763_v20 = vadd.f32 %v1762_v16, %v1594_v17  ;;  %v2307_v16 = vld [vmem:[%s3278_s15 + $0x178] sm:$0xf0] }
  0xcf   : > { %v2310_v26 = vor.u32 %v2811_v15, %v2307_v16 }
  0xd0   : > { %1922 = vst [vmem:[%s3363_s19] sm:$0xff] %v1763_v20  ;;  %v2298_v20 = vor.u32 %v2812_v10, %v2297_v9 }
  0xd3   : > { %v1595_v30 = vpop.f32.mrf.mxu2  ;;  %v1260_v35 = vpop.f32.mrf.mxu0 }
  0xd4   : > { %v1764_v31 = vpop.f32.mrf.mxu3  ;;  %v1596_v34 = vadd.f32 %v1595_v30, %v1427_v29  ;;  %v1429_v36 = vpop.f32.mrf.mxu1 }
  0xd5   : > { %v1430_v40 = vadd.f32 %v1429_v36, %v1260_v35  ;;  %v2313_v35 = vld [vmem:[%s3278_s15 + $0x180] sm:$0xf]  ;;  %v2816_v36 = vld [vmem:[%s3278_s15 + $0x18c] sm:$0xf0] }
  0xd6   : > { %v1765_v39 = vadd.f32 %v1764_v31, %v1596_v34  ;;  %1299 = vmatmul.bf16.gmra.mxu0 %v2266_v32 }
  0xd7   : > { %1468 = vmatmul.bf16.gmra.mxu1 %v2270_v33 }
  0xd8   : > { %1923 = vst [vmem:[%s3363_s19 + $0x8] sm:$0xff] %v1765_v39  ;;  %1637 = vmatmul.bf16.gmra.mxu2 %v2274_v37  ;;  %v2814_v37 = vld [vmem:[%s3278_s15 + $0x184] sm:$0xf]  ;;  %v2321_v39 = vld [vmem:[%s3278_s15 + $0x188] sm:$0xf] }
  0xd9   : > { %1806 = vmatmul.bf16.gmra.mxu3 %v2278_v38  ;;  %v2315_v38 = vld [vmem:[%s3278_s15 + $0x190] sm:$0xf0] }
  0xda   : > { %v2318_v47 = vor.u32 %v2814_v37, %v2315_v38 }
  0xdb   : > { %v1598_v41 = vpop.f32.mrf.mxu2  ;;  %v1262_v44 = vpop.f32.mrf.mxu0 }
  0xdc   : > { %v1767_v42 = vpop.f32.mrf.mxu3  ;;  %v1599_v43 = vadd.f32 %v1598_v41, %v1430_v40  ;;  %v1431_v45 = vpop.f32.mrf.mxu1  ;;  %v2817_v40 = vld [vmem:[%s3278_s15 + $0x194] sm:$0xf0]  ;;  %v2815_v41 = vld [vmem:[%s3278_s15 + $0x18c] sm:$0xf] }
  0xdd   : > { %v1432_v55 = vadd.f32 %v1431_v45, %v1262_v44  ;;  %v2322_v51 = vor.u32 %v2817_v40, %v2321_v39 }
  0xde   : > { %v1768_v46 = vadd.f32 %v1767_v42, %v1599_v43  ;;  %v2323_v42 = vld [vmem:[%s3278_s15 + $0x198] sm:$0xf0] }
  0xdf   : > { %v2326_v52 = vor.u32 %v2815_v41, %v2323_v42 }
  0xe0   : > { %1924 = vst [vmem:[%s3363_s19 + $0x10] sm:$0xff] %v1768_v46  ;;  %v2314_v46 = vor.u32 %v2816_v36, %v2313_v35 }
  0xe3   : > { %v1600_v56 = vpop.f32.mrf.mxu2  ;;  %v1265_v61 = vpop.f32.mrf.mxu0 }
  0xe4   : > { %v1769_v57 = vpop.f32.mrf.mxu3  ;;  %v1601_v60 = vadd.f32 %v1600_v56, %v1432_v55  ;;  %v1434_v62 = vpop.f32.mrf.mxu1 }
  0xe5   : > { %v1435_v2 = vadd.f32 %v1434_v62, %v1265_v61  ;;  %v2329_v61 = vld [vmem:[%s3278_s15 + $0x1a0] sm:$0xf]  ;;  %v2820_v62 = vld [vmem:[%s3278_s15 + $0x1ac] sm:$0xf0] }
  0xe6   : > { %v1770_v1 = vadd.f32 %v1769_v57, %v1601_v60  ;;  %1304 = vmatmul.bf16.gmra.mxu0 %v2282_v58 }
  0xe7   : > { %1473 = vmatmul.bf16.gmra.mxu1 %v2286_v59 }
  0xe8   : > { %1925 = vst [vmem:[%s3363_s19 + $0x18] sm:$0xff] %v1770_v1  ;;  %1642 = vmatmul.bf16.gmra.mxu2 %v2290_v63  ;;  %v2818_v63 = vld [vmem:[%s3278_s15 + $0x1a4] sm:$0xf]  ;;  %v2337_v1 = vld [vmem:[%s3278_s15 + $0x1a8] sm:$0xf] }
  0xe9   : > { %1811 = vmatmul.bf16.gmra.mxu3 %v2294_v0  ;;  %v2331_v0 = vld [vmem:[%s3278_s15 + $0x1b0] sm:$0xf0] }
  0xea   : > { %v2334_v9 = vor.u32 %v2818_v63, %v2331_v0 }
  0xeb   : > { %v1603_v3 = vpop.f32.mrf.mxu2  ;;  %v1267_v6 = vpop.f32.mrf.mxu0 }
  0xec   : > { %v1772_v4 = vpop.f32.mrf.mxu3  ;;  %v1604_v5 = vadd.f32 %v1603_v3, %v1435_v2  ;;  %v1436_v7 = vpop.f32.mrf.mxu1  ;;  %v2821_v2 = vld [vmem:[%s3278_s15 + $0x1b4] sm:$0xf0]  ;;  %v2819_v3 = vld [vmem:[%s3278_s15 + $0x1ac] sm:$0xf] }
  0xed   : > { %v1437_v17 = vadd.f32 %v1436_v7, %v1267_v6  ;;  %v2338_v13 = vor.u32 %v2821_v2, %v2337_v1 }
  0xee   : > { %v1773_v8 = vadd.f32 %v1772_v4, %v1604_v5  ;;  %v2339_v4 = vld [vmem:[%s3278_s15 + $0x1b8] sm:$0xf0] }
  0xef   : > { %v2342_v14 = vor.u32 %v2819_v3, %v2339_v4 }
  0xf0   : > { %1926 = vst [vmem:[%s3363_s19 + $0x20] sm:$0xff] %v1773_v8  ;;  %v2330_v8 = vor.u32 %v2820_v62, %v2329_v61 }
  0xf3   : > { %v1605_v18 = vpop.f32.mrf.mxu2  ;;  %v1270_v23 = vpop.f32.mrf.mxu0 }
  0xf4   : > { %v1774_v19 = vpop.f32.mrf.mxu3  ;;  %v1606_v22 = vadd.f32 %v1605_v18, %v1437_v17  ;;  %v1439_v24 = vpop.f32.mrf.mxu1 }
  0xf5   : > { %v1440_v28 = vadd.f32 %v1439_v24, %v1270_v23  ;;  %v2345_v23 = vld [vmem:[%s3278_s15 + $0x1c0] sm:$0xf]  ;;  %v2824_v24 = vld [vmem:[%s3278_s15 + $0x1cc] sm:$0xf0] }
  0xf6   : > { %v1775_v27 = vadd.f32 %v1774_v19, %v1606_v22  ;;  %1309 = vmatmul.bf16.gmra.mxu0 %v2298_v20 }
  0xf7   : > { %1478 = vmatmul.bf16.gmra.mxu1 %v2302_v21 }
  0xf8   : > { %1927 = vst [vmem:[%s3363_s19 + $0x28] sm:$0xff] %v1775_v27  ;;  %1647 = vmatmul.bf16.gmra.mxu2 %v2306_v25  ;;  %v2822_v25 = vld [vmem:[%s3278_s15 + $0x1c4] sm:$0xf]  ;;  %v2353_v27 = vld [vmem:[%s3278_s15 + $0x1c8] sm:$0xf] }
  0xf9   : > { %1816 = vmatmul.bf16.gmra.mxu3 %v2310_v26  ;;  %v2347_v26 = vld [vmem:[%s3278_s15 + $0x1d0] sm:$0xf0] }
  0xfa   : > { %v2350_v35 = vor.u32 %v2822_v25, %v2347_v26 }
  0xfb   : > { %v1608_v29 = vpop.f32.mrf.mxu2  ;;  %v1272_v32 = vpop.f32.mrf.mxu0 }
  0xfc   : > { %v1777_v30 = vpop.f32.mrf.mxu3  ;;  %v1609_v31 = vadd.f32 %v1608_v29, %v1440_v28  ;;  %v1441_v33 = vpop.f32.mrf.mxu1  ;;  %v2825_v28 = vld [vmem:[%s3278_s15 + $0x1d4] sm:$0xf0]  ;;  %v2823_v29 = vld [vmem:[%s3278_s15 + $0x1cc] sm:$0xf] }
  0xfd   : > { %v1442_v43 = vadd.f32 %v1441_v33, %v1272_v32  ;;  %v2354_v39 = vor.u32 %v2825_v28, %v2353_v27 }
  0xfe   : > { %v1778_v34 = vadd.f32 %v1777_v30, %v1609_v31  ;;  %v2355_v30 = vld [vmem:[%s3278_s15 + $0x1d8] sm:$0xf0] }
  0xff   : > { %v2358_v40 = vor.u32 %v2823_v29, %v2355_v30 }
 0x100   : > { %1928 = vst [vmem:[%s3363_s19 + $0x30] sm:$0xff] %v1778_v34  ;;  %v2346_v34 = vor.u32 %v2824_v24, %v2345_v23 }
 0x103   : > { %v1610_v44 = vpop.f32.mrf.mxu2  ;;  %v1275_v49 = vpop.f32.mrf.mxu0 }
 0x104   : > { %v1779_v45 = vpop.f32.mrf.mxu3  ;;  %v1611_v48 = vadd.f32 %v1610_v44, %v1442_v43  ;;  %v1444_v50 = vpop.f32.mrf.mxu1 }
 0x105   : > { %v1445_v54 = vadd.f32 %v1444_v50, %v1275_v49  ;;  %v2361_v49 = vld [vmem:[%s3278_s15 + $0x1e0] sm:$0xf]  ;;  %v2828_v50 = vld [vmem:[%s3278_s15 + $0x1ec] sm:$0xf0] }
 0x106   : > { %v1780_v53 = vadd.f32 %v1779_v45, %v1611_v48  ;;  %1314 = vmatmul.bf16.gmra.mxu0 %v2314_v46 }
 0x107   : > { %1483 = vmatmul.bf16.gmra.mxu1 %v2318_v47 }
 0x108   : > { %1929 = vst [vmem:[%s3363_s19 + $0x38] sm:$0xff] %v1780_v53  ;;  %1652 = vmatmul.bf16.gmra.mxu2 %v2322_v51  ;;  %v2826_v51 = vld [vmem:[%s3278_s15 + $0x1e4] sm:$0xf]  ;;  %v2369_v53 = vld [vmem:[%s3278_s15 + $0x1e8] sm:$0xf] }
 0x109   : > { %1821 = vmatmul.bf16.gmra.mxu3 %v2326_v52  ;;  %v2363_v52 = vld [vmem:[%s3278_s15 + $0x1f0] sm:$0xf0] }
 0x10a   : > { %v2366_v61 = vor.u32 %v2826_v51, %v2363_v52 }
 0x10b   : > { %v1613_v55 = vpop.f32.mrf.mxu2  ;;  %v1277_v58 = vpop.f32.mrf.mxu0 }
 0x10c   : > { %v1782_v56 = vpop.f32.mrf.mxu3  ;;  %v1614_v57 = vadd.f32 %v1613_v55, %v1445_v54  ;;  %v1446_v59 = vpop.f32.mrf.mxu1  ;;  %v2829_v54 = vld [vmem:[%s3278_s15 + $0x1f4] sm:$0xf0]  ;;  %v2827_v55 = vld [vmem:[%s3278_s15 + $0x1ec] sm:$0xf] }
 0x10d   : > { %v1447_v5 = vadd.f32 %v1446_v59, %v1277_v58  ;;  %v2370_v1 = vor.u32 %v2829_v54, %v2369_v53 }
 0x10e   : > { %v1783_v60 = vadd.f32 %v1782_v56, %v1614_v57  ;;  %v2371_v56 = vld [vmem:[%s3278_s15 + $0x1f8] sm:$0xf0] }
 0x10f   : > { %v2374_v2 = vor.u32 %v2827_v55, %v2371_v56 }
 0x110   : > { %1930 = vst [vmem:[%s3363_s19 + $0x40] sm:$0xff] %v1783_v60  ;;  %v2362_v60 = vor.u32 %v2828_v50, %v2361_v49 }
 0x113   : > { %v1615_v6 = vpop.f32.mrf.mxu2  ;;  %v1280_v11 = vpop.f32.mrf.mxu0 }
 0x114   : > { %v1784_v7 = vpop.f32.mrf.mxu3  ;;  %v1616_v10 = vadd.f32 %v1615_v6, %v1447_v5  ;;  %v1449_v12 = vpop.f32.mrf.mxu1 }
 0x115   : > { %v1450_v16 = vadd.f32 %v1449_v12, %v1280_v11  ;;  %v2377_v11 = vld [vmem:[%s3278_s15 + $0x200] sm:$0xf]  ;;  %v2832_v12 = vld [vmem:[%s3278_s15 + $0x20c] sm:$0xf0] }
 0x116   : > { %v1785_v15 = vadd.f32 %v1784_v7, %v1616_v10  ;;  %1319 = vmatmul.bf16.gmra.mxu0 %v2330_v8 }
 0x117   : > { %1488 = vmatmul.bf16.gmra.mxu1 %v2334_v9 }
 0x118   : > { %1931 = vst [vmem:[%s3363_s19 + $0x48] sm:$0xff] %v1785_v15  ;;  %1657 = vmatmul.bf16.gmra.mxu2 %v2338_v13  ;;  %v2830_v13 = vld [vmem:[%s3278_s15 + $0x204] sm:$0xf]  ;;  %v2385_v15 = vld [vmem:[%s3278_s15 + $0x208] sm:$0xf] }
 0x119   : > { %1826 = vmatmul.bf16.gmra.mxu3 %v2342_v14  ;;  %v2379_v14 = vld [vmem:[%s3278_s15 + $0x210] sm:$0xf0] }
 0x11a   : > { %v2382_v23 = vor.u32 %v2830_v13, %v2379_v14 }
 0x11b   : > { %v1618_v17 = vpop.f32.mrf.mxu2  ;;  %v1282_v20 = vpop.f32.mrf.mxu0 }
 0x11c   : > { %v1787_v18 = vpop.f32.mrf.mxu3  ;;  %v1619_v19 = vadd.f32 %v1618_v17, %v1450_v16  ;;  %v1451_v21 = vpop.f32.mrf.mxu1  ;;  %v2833_v16 = vld [vmem:[%s3278_s15 + $0x214] sm:$0xf0]  ;;  %v2831_v17 = vld [vmem:[%s3278_s15 + $0x20c] sm:$0xf] }
 0x11d   : > { %v1452_v31 = vadd.f32 %v1451_v21, %v1282_v20  ;;  %v2386_v27 = vor.u32 %v2833_v16, %v2385_v15 }
 0x11e   : > { %v1788_v22 = vadd.f32 %v1787_v18, %v1619_v19  ;;  %v2387_v18 = vld [vmem:[%s3278_s15 + $0x218] sm:$0xf0] }
 0x11f   : > { %v2390_v28 = vor.u32 %v2831_v17, %v2387_v18 }
 0x120   : > { %1932 = vst [vmem:[%s3363_s19 + $0x50] sm:$0xff] %v1788_v22  ;;  %v2378_v22 = vor.u32 %v2832_v12, %v2377_v11 }
 0x123   : > { %v1620_v32 = vpop.f32.mrf.mxu2  ;;  %v1285_v37 = vpop.f32.mrf.mxu0 }
 0x124   : > { %v1789_v33 = vpop.f32.mrf.mxu3  ;;  %v1621_v36 = vadd.f32 %v1620_v32, %v1452_v31  ;;  %v1454_v38 = vpop.f32.mrf.mxu1 }
 0x125   : > { %v1455_v42 = vadd.f32 %v1454_v38, %v1285_v37  ;;  %v2393_v37 = vld [vmem:[%s3278_s15 + $0x220] sm:$0xf]  ;;  %v2836_v38 = vld [vmem:[%s3278_s15 + $0x22c] sm:$0xf0] }
 0x126   : > { %v1790_v41 = vadd.f32 %v1789_v33, %v1621_v36  ;;  %1324 = vmatmul.bf16.gmra.mxu0 %v2346_v34 }
 0x127   : > { %1493 = vmatmul.bf16.gmra.mxu1 %v2350_v35 }
 0x128   : > { %1933 = vst [vmem:[%s3363_s19 + $0x58] sm:$0xff] %v1790_v41  ;;  %1662 = vmatmul.bf16.gmra.mxu2 %v2354_v39  ;;  %v2834_v39 = vld [vmem:[%s3278_s15 + $0x224] sm:$0xf]  ;;  %v2401_v41 = vld [vmem:[%s3278_s15 + $0x228] sm:$0xf] }
 0x129   : > { %1831 = vmatmul.bf16.gmra.mxu3 %v2358_v40  ;;  %v2395_v40 = vld [vmem:[%s3278_s15 + $0x230] sm:$0xf0] }
 0x12a   : > { %v2398_v49 = vor.u32 %v2834_v39, %v2395_v40 }
 0x12b   : > { %v1623_v43 = vpop.f32.mrf.mxu2  ;;  %v1287_v46 = vpop.f32.mrf.mxu0 }
 0x12c   : > { %v1792_v44 = vpop.f32.mrf.mxu3  ;;  %v1624_v45 = vadd.f32 %v1623_v43, %v1455_v42  ;;  %v1456_v47 = vpop.f32.mrf.mxu1  ;;  %v2837_v42 = vld [vmem:[%s3278_s15 + $0x234] sm:$0xf0]  ;;  %v2835_v43 = vld [vmem:[%s3278_s15 + $0x22c] sm:$0xf] }
 0x12d   : > { %v1457_v57 = vadd.f32 %v1456_v47, %v1287_v46  ;;  %v2402_v53 = vor.u32 %v2837_v42, %v2401_v41 }
 0x12e   : > { %v1793_v48 = vadd.f32 %v1792_v44, %v1624_v45  ;;  %v2403_v44 = vld [vmem:[%s3278_s15 + $0x238] sm:$0xf0] }
 0x12f   : > { %v2406_v54 = vor.u32 %v2835_v43, %v2403_v44 }
 0x130   : > { %1934 = vst [vmem:[%s3363_s19 + $0x60] sm:$0xff] %v1793_v48  ;;  %v2394_v48 = vor.u32 %v2836_v38, %v2393_v37 }
 0x133   : > { %v1625_v58 = vpop.f32.mrf.mxu2  ;;  %v1290_v63 = vpop.f32.mrf.mxu0 }
 0x134   : > { %v1794_v59 = vpop.f32.mrf.mxu3  ;;  %v1626_v62 = vadd.f32 %v1625_v58, %v1457_v57  ;;  %v1459_v0 = vpop.f32.mrf.mxu1 }
 0x135   : > { %v1460_v4 = vadd.f32 %v1459_v0, %v1290_v63  ;;  %v2409_v63 = vld [vmem:[%s3278_s15 + $0x240] sm:$0xf]  ;;  %v2840_v0 = vld [vmem:[%s3278_s15 + $0x24c] sm:$0xf0] }
 0x136   : > { %v1795_v3 = vadd.f32 %v1794_v59, %v1626_v62  ;;  %1329 = vmatmul.bf16.gmra.mxu0 %v2362_v60 }
 0x137   : > { %1498 = vmatmul.bf16.gmra.mxu1 %v2366_v61 }
 0x138   : > { %1935 = vst [vmem:[%s3363_s19 + $0x68] sm:$0xff] %v1795_v3  ;;  %1667 = vmatmul.bf16.gmra.mxu2 %v2370_v1  ;;  %v2838_v1 = vld [vmem:[%s3278_s15 + $0x244] sm:$0xf]  ;;  %v2417_v3 = vld [vmem:[%s3278_s15 + $0x248] sm:$0xf] }
 0x139   : > { %1836 = vmatmul.bf16.gmra.mxu3 %v2374_v2  ;;  %v2411_v2 = vld [vmem:[%s3278_s15 + $0x250] sm:$0xf0] }
 0x13a   : > { %v2414_v11 = vor.u32 %v2838_v1, %v2411_v2 }
 0x13b   : > { %v1628_v5 = vpop.f32.mrf.mxu2  ;;  %v1292_v8 = vpop.f32.mrf.mxu0 }
 0x13c   : > { %v1797_v6 = vpop.f32.mrf.mxu3  ;;  %v1629_v7 = vadd.f32 %v1628_v5, %v1460_v4  ;;  %v1461_v9 = vpop.f32.mrf.mxu1  ;;  %v2841_v4 = vld [vmem:[%s3278_s15 + $0x254] sm:$0xf0]  ;;  %v2839_v5 = vld [vmem:[%s3278_s15 + $0x24c] sm:$0xf] }
 0x13d   : > { %v1462_v19 = vadd.f32 %v1461_v9, %v1292_v8  ;;  %v2418_v15 = vor.u32 %v2841_v4, %v2417_v3 }
 0x13e   : > { %v1798_v10 = vadd.f32 %v1797_v6, %v1629_v7  ;;  %v2419_v6 = vld [vmem:[%s3278_s15 + $0x258] sm:$0xf0] }
 0x13f   : > { %v2422_v16 = vor.u32 %v2839_v5, %v2419_v6 }
 0x140   : > { %1936 = vst [vmem:[%s3363_s19 + $0x70] sm:$0xff] %v1798_v10  ;;  %v2410_v10 = vor.u32 %v2840_v0, %v2409_v63 }
 0x143   : > { %v1630_v20 = vpop.f32.mrf.mxu2  ;;  %v1295_v25 = vpop.f32.mrf.mxu0 }
 0x144   : > { %v1799_v21 = vpop.f32.mrf.mxu3  ;;  %v1631_v24 = vadd.f32 %v1630_v20, %v1462_v19  ;;  %v1464_v26 = vpop.f32.mrf.mxu1 }
 0x145   : > { %v1465_v30 = vadd.f32 %v1464_v26, %v1295_v25  ;;  %v2425_v25 = vld [vmem:[%s3278_s15 + $0x260] sm:$0xf]  ;;  %v2844_v26 = vld [vmem:[%s3278_s15 + $0x26c] sm:$0xf0] }
 0x146   : > { %v1800_v29 = vadd.f32 %v1799_v21, %v1631_v24  ;;  %1334 = vmatmul.bf16.gmra.mxu0 %v2378_v22 }
 0x147   : > { %1503 = vmatmul.bf16.gmra.mxu1 %v2382_v23 }
 0x148   : > { %1937 = vst [vmem:[%s3363_s19 + $0x78] sm:$0xff] %v1800_v29  ;;  %1672 = vmatmul.bf16.gmra.mxu2 %v2386_v27  ;;  %v2842_v27 = vld [vmem:[%s3278_s15 + $0x264] sm:$0xf]  ;;  %v2433_v29 = vld [vmem:[%s3278_s15 + $0x268] sm:$0xf] }
 0x149   : > { %1841 = vmatmul.bf16.gmra.mxu3 %v2390_v28  ;;  %v2427_v28 = vld [vmem:[%s3278_s15 + $0x270] sm:$0xf0] }
 0x14a   : > { %v2430_v37 = vor.u32 %v2842_v27, %v2427_v28 }
 0x14b   : > { %v1633_v31 = vpop.f32.mrf.mxu2  ;;  %v1297_v34 = vpop.f32.mrf.mxu0 }
 0x14c   : > { %v1802_v32 = vpop.f32.mrf.mxu3  ;;  %v1634_v33 = vadd.f32 %v1633_v31, %v1465_v30  ;;  %v1466_v35 = vpop.f32.mrf.mxu1  ;;  %v2845_v30 = vld [vmem:[%s3278_s15 + $0x274] sm:$0xf0]  ;;  %v2843_v31 = vld [vmem:[%s3278_s15 + $0x26c] sm:$0xf] }
 0x14d   : > { %v1467_v45 = vadd.f32 %v1466_v35, %v1297_v34  ;;  %v2434_v41 = vor.u32 %v2845_v30, %v2433_v29 }
 0x14e   : > { %v1803_v36 = vadd.f32 %v1802_v32, %v1634_v33  ;;  %v2435_v32 = vld [vmem:[%s3278_s15 + $0x278] sm:$0xf0] }
 0x14f   : > { %v2438_v42 = vor.u32 %v2843_v31, %v2435_v32 }
 0x150   : > { %1938 = vst [vmem:[%s3363_s19 + $0x80] sm:$0xff] %v1803_v36  ;;  %v2426_v36 = vor.u32 %v2844_v26, %v2425_v25 }
 0x153   : > { %v1635_v46 = vpop.f32.mrf.mxu2  ;;  %v1300_v51 = vpop.f32.mrf.mxu0 }
 0x154   : > { %v1804_v47 = vpop.f32.mrf.mxu3  ;;  %v1636_v50 = vadd.f32 %v1635_v46, %v1467_v45  ;;  %v1469_v52 = vpop.f32.mrf.mxu1 }
 0x155   : > { %v1470_v56 = vadd.f32 %v1469_v52, %v1300_v51  ;;  %v2441_v51 = vld [vmem:[%s3278_s15 + $0x280] sm:$0xf]  ;;  %v2848_v52 = vld [vmem:[%s3278_s15 + $0x28c] sm:$0xf0] }
 0x156   : > { %v1805_v55 = vadd.f32 %v1804_v47, %v1636_v50  ;;  %1339 = vmatmul.bf16.gmra.mxu0 %v2394_v48 }
 0x157   : > { %1508 = vmatmul.bf16.gmra.mxu1 %v2398_v49 }
 0x158   : > { %1939 = vst [vmem:[%s3363_s19 + $0x88] sm:$0xff] %v1805_v55  ;;  %1677 = vmatmul.bf16.gmra.mxu2 %v2402_v53  ;;  %v2846_v53 = vld [vmem:[%s3278_s15 + $0x284] sm:$0xf]  ;;  %v2449_v55 = vld [vmem:[%s3278_s15 + $0x288] sm:$0xf] }
 0x159   : > { %1846 = vmatmul.bf16.gmra.mxu3 %v2406_v54  ;;  %v2443_v54 = vld [vmem:[%s3278_s15 + $0x290] sm:$0xf0] }
 0x15a   : > { %v2446_v63 = vor.u32 %v2846_v53, %v2443_v54 }
 0x15b   : > { %v1638_v57 = vpop.f32.mrf.mxu2  ;;  %v1302_v60 = vpop.f32.mrf.mxu0 }
 0x15c   : > { %v1807_v58 = vpop.f32.mrf.mxu3  ;;  %v1639_v59 = vadd.f32 %v1638_v57, %v1470_v56  ;;  %v1471_v61 = vpop.f32.mrf.mxu1  ;;  %v2849_v56 = vld [vmem:[%s3278_s15 + $0x294] sm:$0xf0]  ;;  %v2847_v57 = vld [vmem:[%s3278_s15 + $0x28c] sm:$0xf] }
 0x15d   : > { %v1472_v7 = vadd.f32 %v1471_v61, %v1302_v60  ;;  %v2450_v3 = vor.u32 %v2849_v56, %v2449_v55 }
 0x15e   : > { %v1808_v62 = vadd.f32 %v1807_v58, %v1639_v59  ;;  %v2451_v58 = vld [vmem:[%s3278_s15 + $0x298] sm:$0xf0] }
 0x15f   : > { %v2454_v4 = vor.u32 %v2847_v57, %v2451_v58 }
 0x160   : > { %1940 = vst [vmem:[%s3363_s19 + $0x90] sm:$0xff] %v1808_v62  ;;  %v2442_v62 = vor.u32 %v2848_v52, %v2441_v51 }
 0x163   : > { %v1640_v8 = vpop.f32.mrf.mxu2  ;;  %v1305_v13 = vpop.f32.mrf.mxu0 }
 0x164   : > { %v1809_v9 = vpop.f32.mrf.mxu3  ;;  %v1641_v12 = vadd.f32 %v1640_v8, %v1472_v7  ;;  %v1474_v14 = vpop.f32.mrf.mxu1 }
 0x165   : > { %v1475_v18 = vadd.f32 %v1474_v14, %v1305_v13  ;;  %v2457_v13 = vld [vmem:[%s3278_s15 + $0x2a0] sm:$0xf]  ;;  %v2852_v14 = vld [vmem:[%s3278_s15 + $0x2ac] sm:$0xf0] }
 0x166   : > { %v1810_v17 = vadd.f32 %v1809_v9, %v1641_v12  ;;  %1344 = vmatmul.bf16.gmra.mxu0 %v2410_v10 }
 0x167   : > { %1513 = vmatmul.bf16.gmra.mxu1 %v2414_v11 }
 0x168   : > { %1941 = vst [vmem:[%s3363_s19 + $0x98] sm:$0xff] %v1810_v17  ;;  %1682 = vmatmul.bf16.gmra.mxu2 %v2418_v15  ;;  %v2850_v15 = vld [vmem:[%s3278_s15 + $0x2a4] sm:$0xf]  ;;  %v2465_v17 = vld [vmem:[%s3278_s15 + $0x2a8] sm:$0xf] }
 0x169   : > { %1851 = vmatmul.bf16.gmra.mxu3 %v2422_v16  ;;  %v2459_v16 = vld [vmem:[%s3278_s15 + $0x2b0] sm:$0xf0] }
 0x16a   : > { %v2462_v25 = vor.u32 %v2850_v15, %v2459_v16 }
 0x16b   : > { %v1643_v19 = vpop.f32.mrf.mxu2  ;;  %v1307_v22 = vpop.f32.mrf.mxu0 }
 0x16c   : > { %v1812_v20 = vpop.f32.mrf.mxu3  ;;  %v1644_v21 = vadd.f32 %v1643_v19, %v1475_v18  ;;  %v1476_v23 = vpop.f32.mrf.mxu1  ;;  %v2853_v18 = vld [vmem:[%s3278_s15 + $0x2b4] sm:$0xf0]  ;;  %v2851_v19 = vld [vmem:[%s3278_s15 + $0x2ac] sm:$0xf] }
 0x16d   : > { %v1477_v33 = vadd.f32 %v1476_v23, %v1307_v22  ;;  %v2466_v29 = vor.u32 %v2853_v18, %v2465_v17 }
 0x16e   : > { %v1813_v24 = vadd.f32 %v1812_v20, %v1644_v21  ;;  %v2467_v20 = vld [vmem:[%s3278_s15 + $0x2b8] sm:$0xf0] }
 0x16f   : > { %v2470_v30 = vor.u32 %v2851_v19, %v2467_v20 }
 0x170   : > { %1942 = vst [vmem:[%s3363_s19 + $0xa0] sm:$0xff] %v1813_v24  ;;  %v2458_v24 = vor.u32 %v2852_v14, %v2457_v13 }
 0x173   : > { %v1645_v34 = vpop.f32.mrf.mxu2  ;;  %v1310_v39 = vpop.f32.mrf.mxu0 }
 0x174   : > { %v1814_v35 = vpop.f32.mrf.mxu3  ;;  %v1646_v38 = vadd.f32 %v1645_v34, %v1477_v33  ;;  %v1479_v40 = vpop.f32.mrf.mxu1 }
 0x175   : > { %v1480_v44 = vadd.f32 %v1479_v40, %v1310_v39  ;;  %v2473_v39 = vld [vmem:[%s3278_s15 + $0x2c0] sm:$0xf]  ;;  %v2856_v40 = vld [vmem:[%s3278_s15 + $0x2cc] sm:$0xf0] }
 0x176   : > { %v1815_v43 = vadd.f32 %v1814_v35, %v1646_v38  ;;  %1349 = vmatmul.bf16.gmra.mxu0 %v2426_v36 }
 0x177   : > { %1518 = vmatmul.bf16.gmra.mxu1 %v2430_v37 }
 0x178   : > { %1943 = vst [vmem:[%s3363_s19 + $0xa8] sm:$0xff] %v1815_v43  ;;  %1687 = vmatmul.bf16.gmra.mxu2 %v2434_v41  ;;  %v2854_v41 = vld [vmem:[%s3278_s15 + $0x2c4] sm:$0xf]  ;;  %v2481_v43 = vld [vmem:[%s3278_s15 + $0x2c8] sm:$0xf] }
 0x179   : > { %1856 = vmatmul.bf16.gmra.mxu3 %v2438_v42  ;;  %v2475_v42 = vld [vmem:[%s3278_s15 + $0x2d0] sm:$0xf0] }
 0x17a   : > { %v2478_v51 = vor.u32 %v2854_v41, %v2475_v42 }
 0x17b   : > { %v1648_v45 = vpop.f32.mrf.mxu2  ;;  %v1312_v48 = vpop.f32.mrf.mxu0 }
 0x17c   : > { %v1817_v46 = vpop.f32.mrf.mxu3  ;;  %v1649_v47 = vadd.f32 %v1648_v45, %v1480_v44  ;;  %v1481_v49 = vpop.f32.mrf.mxu1  ;;  %v2857_v44 = vld [vmem:[%s3278_s15 + $0x2d4] sm:$0xf0]  ;;  %v2855_v45 = vld [vmem:[%s3278_s15 + $0x2cc] sm:$0xf] }
 0x17d   : > { %v1482_v59 = vadd.f32 %v1481_v49, %v1312_v48  ;;  %v2482_v55 = vor.u32 %v2857_v44, %v2481_v43 }
 0x17e   : > { %v1818_v50 = vadd.f32 %v1817_v46, %v1649_v47  ;;  %v2483_v46 = vld [vmem:[%s3278_s15 + $0x2d8] sm:$0xf0] }
 0x17f   : > { %v2486_v56 = vor.u32 %v2855_v45, %v2483_v46 }
 0x180   : > { %1944 = vst [vmem:[%s3363_s19 + $0xb0] sm:$0xff] %v1818_v50  ;;  %v2474_v50 = vor.u32 %v2856_v40, %v2473_v39 }
 0x183   : > { %v1650_v60 = vpop.f32.mrf.mxu2  ;;  %v1315_v1 = vpop.f32.mrf.mxu0 }
 0x184   : > { %v1819_v61 = vpop.f32.mrf.mxu3  ;;  %v1651_v0 = vadd.f32 %v1650_v60, %v1482_v59  ;;  %v1484_v2 = vpop.f32.mrf.mxu1 }
 0x185   : > { %v1485_v6 = vadd.f32 %v1484_v2, %v1315_v1  ;;  %v2489_v1 = vld [vmem:[%s3278_s15 + $0x2e0] sm:$0xf]  ;;  %v2860_v2 = vld [vmem:[%s3278_s15 + $0x2ec] sm:$0xf0] }
 0x186   : > { %v1820_v5 = vadd.f32 %v1819_v61, %v1651_v0  ;;  %1354 = vmatmul.bf16.gmra.mxu0 %v2442_v62 }
 0x187   : > { %1523 = vmatmul.bf16.gmra.mxu1 %v2446_v63 }
 0x188   : > { %1945 = vst [vmem:[%s3363_s19 + $0xb8] sm:$0xff] %v1820_v5  ;;  %1692 = vmatmul.bf16.gmra.mxu2 %v2450_v3  ;;  %v2858_v3 = vld [vmem:[%s3278_s15 + $0x2e4] sm:$0xf]  ;;  %v2497_v5 = vld [vmem:[%s3278_s15 + $0x2e8] sm:$0xf] }
 0x189   : > { %1861 = vmatmul.bf16.gmra.mxu3 %v2454_v4  ;;  %v2491_v4 = vld [vmem:[%s3278_s15 + $0x2f0] sm:$0xf0] }
 0x18a   : > { %v2494_v13 = vor.u32 %v2858_v3, %v2491_v4 }
 0x18b   : > { %v1653_v7 = vpop.f32.mrf.mxu2  ;;  %v1317_v10 = vpop.f32.mrf.mxu0 }
 0x18c   : > { %v1822_v8 = vpop.f32.mrf.mxu3  ;;  %v1654_v9 = vadd.f32 %v1653_v7, %v1485_v6  ;;  %v1486_v11 = vpop.f32.mrf.mxu1  ;;  %v2861_v6 = vld [vmem:[%s3278_s15 + $0x2f4] sm:$0xf0]  ;;  %v2859_v7 = vld [vmem:[%s3278_s15 + $0x2ec] sm:$0xf] }
 0x18d   : > { %v1487_v21 = vadd.f32 %v1486_v11, %v1317_v10  ;;  %v2498_v17 = vor.u32 %v2861_v6, %v2497_v5 }
 0x18e   : > { %v1823_v12 = vadd.f32 %v1822_v8, %v1654_v9  ;;  %v2499_v8 = vld [vmem:[%s3278_s15 + $0x2f8] sm:$0xf0] }
 0x18f   : > { %v2502_v18 = vor.u32 %v2859_v7, %v2499_v8 }
 0x190   : > { %1946 = vst [vmem:[%s3363_s19 + $0xc0] sm:$0xff] %v1823_v12  ;;  %v2490_v12 = vor.u32 %v2860_v2, %v2489_v1 }
 0x193   : > { %v1655_v22 = vpop.f32.mrf.mxu2  ;;  %v1320_v27 = vpop.f32.mrf.mxu0 }
 0x194   : > { %v1824_v23 = vpop.f32.mrf.mxu3  ;;  %v1656_v26 = vadd.f32 %v1655_v22, %v1487_v21  ;;  %v1489_v28 = vpop.f32.mrf.mxu1 }
 0x195   : > { %v1490_v32 = vadd.f32 %v1489_v28, %v1320_v27  ;;  %v2505_v27 = vld [vmem:[%s3278_s15 + $0x300] sm:$0xf]  ;;  %v2864_v28 = vld [vmem:[%s3278_s15 + $0x30c] sm:$0xf0] }
 0x196   : > { %v1825_v31 = vadd.f32 %v1824_v23, %v1656_v26  ;;  %1359 = vmatmul.bf16.gmra.mxu0 %v2458_v24 }
 0x197   : > { %1528 = vmatmul.bf16.gmra.mxu1 %v2462_v25 }
 0x198   : > { %1947 = vst [vmem:[%s3363_s19 + $0xc8] sm:$0xff] %v1825_v31  ;;  %1697 = vmatmul.bf16.gmra.mxu2 %v2466_v29  ;;  %v2862_v29 = vld [vmem:[%s3278_s15 + $0x304] sm:$0xf]  ;;  %v2513_v31 = vld [vmem:[%s3278_s15 + $0x308] sm:$0xf] }
 0x199   : > { %1866 = vmatmul.bf16.gmra.mxu3 %v2470_v30  ;;  %v2507_v30 = vld [vmem:[%s3278_s15 + $0x310] sm:$0xf0] }
 0x19a   : > { %v2510_v39 = vor.u32 %v2862_v29, %v2507_v30 }
 0x19b   : > { %v1658_v33 = vpop.f32.mrf.mxu2  ;;  %v1322_v36 = vpop.f32.mrf.mxu0 }
 0x19c   : > { %v1827_v34 = vpop.f32.mrf.mxu3  ;;  %v1659_v35 = vadd.f32 %v1658_v33, %v1490_v32  ;;  %v1491_v37 = vpop.f32.mrf.mxu1  ;;  %v2865_v32 = vld [vmem:[%s3278_s15 + $0x314] sm:$0xf0]  ;;  %v2863_v33 = vld [vmem:[%s3278_s15 + $0x30c] sm:$0xf] }
 0x19d   : > { %v1492_v47 = vadd.f32 %v1491_v37, %v1322_v36  ;;  %v2514_v43 = vor.u32 %v2865_v32, %v2513_v31 }
 0x19e   : > { %v1828_v38 = vadd.f32 %v1827_v34, %v1659_v35  ;;  %v2515_v34 = vld [vmem:[%s3278_s15 + $0x318] sm:$0xf0] }
 0x19f   : > { %v2518_v44 = vor.u32 %v2863_v33, %v2515_v34 }
 0x1a0   : > { %1948 = vst [vmem:[%s3363_s19 + $0xd0] sm:$0xff] %v1828_v38  ;;  %v2506_v38 = vor.u32 %v2864_v28, %v2505_v27 }
 0x1a3   : > { %v1660_v48 = vpop.f32.mrf.mxu2  ;;  %v1325_v53 = vpop.f32.mrf.mxu0 }
 0x1a4   : > { %v1829_v49 = vpop.f32.mrf.mxu3  ;;  %v1661_v52 = vadd.f32 %v1660_v48, %v1492_v47  ;;  %v1494_v54 = vpop.f32.mrf.mxu1 }
 0x1a5   : > { %v1495_v58 = vadd.f32 %v1494_v54, %v1325_v53  ;;  %v2521_v53 = vld [vmem:[%s3278_s15 + $0x320] sm:$0xf]  ;;  %v2868_v54 = vld [vmem:[%s3278_s15 + $0x32c] sm:$0xf0] }
 0x1a6   : > { %v1830_v57 = vadd.f32 %v1829_v49, %v1661_v52  ;;  %1364 = vmatmul.bf16.gmra.mxu0 %v2474_v50 }
 0x1a7   : > { %1533 = vmatmul.bf16.gmra.mxu1 %v2478_v51 }
 0x1a8   : > { %1949 = vst [vmem:[%s3363_s19 + $0xd8] sm:$0xff] %v1830_v57  ;;  %1702 = vmatmul.bf16.gmra.mxu2 %v2482_v55  ;;  %v2866_v55 = vld [vmem:[%s3278_s15 + $0x324] sm:$0xf]  ;;  %v2529_v57 = vld [vmem:[%s3278_s15 + $0x328] sm:$0xf] }
 0x1a9   : > { %1871 = vmatmul.bf16.gmra.mxu3 %v2486_v56  ;;  %v2523_v56 = vld [vmem:[%s3278_s15 + $0x330] sm:$0xf0] }
 0x1aa   : > { %v2526_v1 = vor.u32 %v2866_v55, %v2523_v56 }
 0x1ab   : > { %v1663_v59 = vpop.f32.mrf.mxu2  ;;  %v1327_v62 = vpop.f32.mrf.mxu0 }
 0x1ac   : > { %v1832_v60 = vpop.f32.mrf.mxu3  ;;  %v1664_v61 = vadd.f32 %v1663_v59, %v1495_v58  ;;  %v1496_v63 = vpop.f32.mrf.mxu1  ;;  %v2869_v58 = vld [vmem:[%s3278_s15 + $0x334] sm:$0xf0]  ;;  %v2867_v59 = vld [vmem:[%s3278_s15 + $0x32c] sm:$0xf] }
 0x1ad   : > { %v1497_v9 = vadd.f32 %v1496_v63, %v1327_v62  ;;  %v2530_v5 = vor.u32 %v2869_v58, %v2529_v57 }
 0x1ae   : > { %v1833_v0 = vadd.f32 %v1832_v60, %v1664_v61  ;;  %v2531_v60 = vld [vmem:[%s3278_s15 + $0x338] sm:$0xf0] }
 0x1af   : > { %v2534_v6 = vor.u32 %v2867_v59, %v2531_v60 }
 0x1b0   : > { %1950 = vst [vmem:[%s3363_s19 + $0xe0] sm:$0xff] %v1833_v0  ;;  %v2522_v0 = vor.u32 %v2868_v54, %v2521_v53 }
 0x1b3   : > { %v1665_v10 = vpop.f32.mrf.mxu2  ;;  %v1330_v15 = vpop.f32.mrf.mxu0 }
 0x1b4   : > { %v1834_v11 = vpop.f32.mrf.mxu3  ;;  %v1666_v14 = vadd.f32 %v1665_v10, %v1497_v9  ;;  %v1499_v16 = vpop.f32.mrf.mxu1 }
 0x1b5   : > { %v1500_v20 = vadd.f32 %v1499_v16, %v1330_v15  ;;  %v2537_v15 = vld [vmem:[%s3278_s15 + $0x340] sm:$0xf]  ;;  %v2872_v16 = vld [vmem:[%s3278_s15 + $0x34c] sm:$0xf0] }
 0x1b6   : > { %v1835_v19 = vadd.f32 %v1834_v11, %v1666_v14  ;;  %1369 = vmatmul.bf16.gmra.mxu0 %v2490_v12 }
 0x1b7   : > { %1538 = vmatmul.bf16.gmra.mxu1 %v2494_v13 }
 0x1b8   : > { %1951 = vst [vmem:[%s3363_s19 + $0xe8] sm:$0xff] %v1835_v19  ;;  %1707 = vmatmul.bf16.gmra.mxu2 %v2498_v17  ;;  %v2870_v17 = vld [vmem:[%s3278_s15 + $0x344] sm:$0xf]  ;;  %v2545_v19 = vld [vmem:[%s3278_s15 + $0x348] sm:$0xf] }
 0x1b9   : > { %1876 = vmatmul.bf16.gmra.mxu3 %v2502_v18  ;;  %v2539_v18 = vld [vmem:[%s3278_s15 + $0x350] sm:$0xf0] }
 0x1ba   : > { %v2542_v27 = vor.u32 %v2870_v17, %v2539_v18 }
 0x1bb   : > { %v1668_v21 = vpop.f32.mrf.mxu2  ;;  %v1332_v24 = vpop.f32.mrf.mxu0 }
 0x1bc   : > { %v1837_v22 = vpop.f32.mrf.mxu3  ;;  %v1669_v23 = vadd.f32 %v1668_v21, %v1500_v20  ;;  %v1501_v25 = vpop.f32.mrf.mxu1  ;;  %v2873_v20 = vld [vmem:[%s3278_s15 + $0x354] sm:$0xf0]  ;;  %v2871_v21 = vld [vmem:[%s3278_s15 + $0x34c] sm:$0xf] }
 0x1bd   : > { %v1502_v35 = vadd.f32 %v1501_v25, %v1332_v24  ;;  %v2546_v31 = vor.u32 %v2873_v20, %v2545_v19 }
 0x1be   : > { %v1838_v26 = vadd.f32 %v1837_v22, %v1669_v23  ;;  %v2547_v22 = vld [vmem:[%s3278_s15 + $0x358] sm:$0xf0] }
 0x1bf   : > { %v2550_v32 = vor.u32 %v2871_v21, %v2547_v22 }
 0x1c0   : > { %1952 = vst [vmem:[%s3363_s19 + $0xf0] sm:$0xff] %v1838_v26  ;;  %v2538_v26 = vor.u32 %v2872_v16, %v2537_v15 }
 0x1c3   : > { %v1670_v36 = vpop.f32.mrf.mxu2  ;;  %v1335_v41 = vpop.f32.mrf.mxu0 }
 0x1c4   : > { %v1839_v37 = vpop.f32.mrf.mxu3  ;;  %v1671_v40 = vadd.f32 %v1670_v36, %v1502_v35  ;;  %v1504_v42 = vpop.f32.mrf.mxu1 }
 0x1c5   : > { %v1505_v46 = vadd.f32 %v1504_v42, %v1335_v41  ;;  %v2553_v41 = vld [vmem:[%s3278_s15 + $0x360] sm:$0xf]  ;;  %v2876_v42 = vld [vmem:[%s3278_s15 + $0x36c] sm:$0xf0] }
 0x1c6   : > { %v1840_v45 = vadd.f32 %v1839_v37, %v1671_v40  ;;  %1374 = vmatmul.bf16.gmra.mxu0 %v2506_v38 }
 0x1c7   : > { %1543 = vmatmul.bf16.gmra.mxu1 %v2510_v39 }
 0x1c8   : > { %1953 = vst [vmem:[%s3363_s19 + $0xf8] sm:$0xff] %v1840_v45  ;;  %1712 = vmatmul.bf16.gmra.mxu2 %v2514_v43  ;;  %v2874_v43 = vld [vmem:[%s3278_s15 + $0x364] sm:$0xf]  ;;  %v2561_v45 = vld [vmem:[%s3278_s15 + $0x368] sm:$0xf] }
 0x1c9   : > { %1881 = vmatmul.bf16.gmra.mxu3 %v2518_v44  ;;  %v2555_v44 = vld [vmem:[%s3278_s15 + $0x370] sm:$0xf0] }
 0x1ca   : > { %v2558_v53 = vor.u32 %v2874_v43, %v2555_v44 }
 0x1cb   : > { %v1673_v47 = vpop.f32.mrf.mxu2  ;;  %v1337_v50 = vpop.f32.mrf.mxu0 }
 0x1cc   : > { %v1842_v48 = vpop.f32.mrf.mxu3  ;;  %v1674_v49 = vadd.f32 %v1673_v47, %v1505_v46  ;;  %v1506_v51 = vpop.f32.mrf.mxu1  ;;  %v2877_v46 = vld [vmem:[%s3278_s15 + $0x374] sm:$0xf0]  ;;  %v2875_v47 = vld [vmem:[%s3278_s15 + $0x36c] sm:$0xf] }
 0x1cd   : > { %v1507_v61 = vadd.f32 %v1506_v51, %v1337_v50  ;;  %v2562_v57 = vor.u32 %v2877_v46, %v2561_v45 }
 0x1ce   : > { %v1843_v52 = vadd.f32 %v1842_v48, %v1674_v49  ;;  %v2563_v48 = vld [vmem:[%s3278_s15 + $0x378] sm:$0xf0] }
 0x1cf   : > { %v2566_v58 = vor.u32 %v2875_v47, %v2563_v48 }
 0x1d0   : > { %1954 = vst [vmem:[%s3363_s19 + $0x100] sm:$0xff] %v1843_v52  ;;  %v2554_v52 = vor.u32 %v2876_v42, %v2553_v41 }
 0x1d3   : > { %v1675_v62 = vpop.f32.mrf.mxu2  ;;  %v1340_v3 = vpop.f32.mrf.mxu0 }
 0x1d4   : > { %v1844_v63 = vpop.f32.mrf.mxu3  ;;  %v1676_v2 = vadd.f32 %v1675_v62, %v1507_v61  ;;  %v1509_v4 = vpop.f32.mrf.mxu1 }
 0x1d5   : > { %v1510_v8 = vadd.f32 %v1509_v4, %v1340_v3  ;;  %v2569_v3 = vld [vmem:[%s3278_s15 + $0x380] sm:$0xf]  ;;  %v2880_v4 = vld [vmem:[%s3278_s15 + $0x38c] sm:$0xf0] }
 0x1d6   : > { %v1845_v7 = vadd.f32 %v1844_v63, %v1676_v2  ;;  %1379 = vmatmul.bf16.gmra.mxu0 %v2522_v0 }
 0x1d7   : > { %1548 = vmatmul.bf16.gmra.mxu1 %v2526_v1 }
 0x1d8   : > { %1955 = vst [vmem:[%s3363_s19 + $0x108] sm:$0xff] %v1845_v7  ;;  %1717 = vmatmul.bf16.gmra.mxu2 %v2530_v5  ;;  %v2878_v5 = vld [vmem:[%s3278_s15 + $0x384] sm:$0xf]  ;;  %v2577_v7 = vld [vmem:[%s3278_s15 + $0x388] sm:$0xf] }
 0x1d9   : > { %1886 = vmatmul.bf16.gmra.mxu3 %v2534_v6  ;;  %v2571_v6 = vld [vmem:[%s3278_s15 + $0x390] sm:$0xf0] }
 0x1da   : > { %v2574_v15 = vor.u32 %v2878_v5, %v2571_v6 }
 0x1db   : > { %v1678_v9 = vpop.f32.mrf.mxu2  ;;  %v1342_v12 = vpop.f32.mrf.mxu0 }
 0x1dc   : > { %v1847_v10 = vpop.f32.mrf.mxu3  ;;  %v1679_v11 = vadd.f32 %v1678_v9, %v1510_v8  ;;  %v1511_v13 = vpop.f32.mrf.mxu1  ;;  %v2881_v8 = vld [vmem:[%s3278_s15 + $0x394] sm:$0xf0]  ;;  %v2879_v9 = vld [vmem:[%s3278_s15 + $0x38c] sm:$0xf] }
 0x1dd   : > { %v1512_v23 = vadd.f32 %v1511_v13, %v1342_v12  ;;  %v2578_v19 = vor.u32 %v2881_v8, %v2577_v7 }
 0x1de   : > { %v1848_v14 = vadd.f32 %v1847_v10, %v1679_v11  ;;  %v2579_v10 = vld [vmem:[%s3278_s15 + $0x398] sm:$0xf0] }
 0x1df   : > { %v2582_v20 = vor.u32 %v2879_v9, %v2579_v10 }
 0x1e0   : > { %1956 = vst [vmem:[%s3363_s19 + $0x110] sm:$0xff] %v1848_v14  ;;  %v2570_v14 = vor.u32 %v2880_v4, %v2569_v3 }
 0x1e3   : > { %v1680_v24 = vpop.f32.mrf.mxu2  ;;  %v1345_v29 = vpop.f32.mrf.mxu0 }
 0x1e4   : > { %v1849_v25 = vpop.f32.mrf.mxu3  ;;  %v1681_v28 = vadd.f32 %v1680_v24, %v1512_v23  ;;  %v1514_v30 = vpop.f32.mrf.mxu1 }
 0x1e5   : > { %v1515_v34 = vadd.f32 %v1514_v30, %v1345_v29  ;;  %v2585_v29 = vld [vmem:[%s3278_s15 + $0x3a0] sm:$0xf]  ;;  %v2884_v30 = vld [vmem:[%s3278_s15 + $0x3ac] sm:$0xf0] }
 0x1e6   : > { %v1850_v33 = vadd.f32 %v1849_v25, %v1681_v28  ;;  %1384 = vmatmul.bf16.gmra.mxu0 %v2538_v26 }
 0x1e7   : > { %1553 = vmatmul.bf16.gmra.mxu1 %v2542_v27 }
 0x1e8   : > { %1957 = vst [vmem:[%s3363_s19 + $0x118] sm:$0xff] %v1850_v33  ;;  %1722 = vmatmul.bf16.gmra.mxu2 %v2546_v31  ;;  %v2882_v31 = vld [vmem:[%s3278_s15 + $0x3a4] sm:$0xf]  ;;  %v2593_v33 = vld [vmem:[%s3278_s15 + $0x3a8] sm:$0xf] }
 0x1e9   : > { %1891 = vmatmul.bf16.gmra.mxu3 %v2550_v32  ;;  %v2587_v32 = vld [vmem:[%s3278_s15 + $0x3b0] sm:$0xf0] }
 0x1ea   : > { %v2590_v41 = vor.u32 %v2882_v31, %v2587_v32 }
 0x1eb   : > { %v1683_v35 = vpop.f32.mrf.mxu2  ;;  %v1347_v38 = vpop.f32.mrf.mxu0 }
 0x1ec   : > { %v1852_v36 = vpop.f32.mrf.mxu3  ;;  %v1684_v37 = vadd.f32 %v1683_v35, %v1515_v34  ;;  %v1516_v39 = vpop.f32.mrf.mxu1  ;;  %v2885_v34 = vld [vmem:[%s3278_s15 + $0x3b4] sm:$0xf0]  ;;  %v2883_v35 = vld [vmem:[%s3278_s15 + $0x3ac] sm:$0xf] }
 0x1ed   : > { %v1517_v49 = vadd.f32 %v1516_v39, %v1347_v38  ;;  %v2594_v45 = vor.u32 %v2885_v34, %v2593_v33 }
 0x1ee   : > { %v1853_v40 = vadd.f32 %v1852_v36, %v1684_v37  ;;  %v2595_v36 = vld [vmem:[%s3278_s15 + $0x3b8] sm:$0xf0] }
 0x1ef   : > { %v2598_v46 = vor.u32 %v2883_v35, %v2595_v36 }
 0x1f0   : > { %1958 = vst [vmem:[%s3363_s19 + $0x120] sm:$0xff] %v1853_v40  ;;  %v2586_v40 = vor.u32 %v2884_v30, %v2585_v29 }
 0x1f3   : > { %v1685_v50 = vpop.f32.mrf.mxu2  ;;  %v1350_v55 = vpop.f32.mrf.mxu0 }
 0x1f4   : > { %v1854_v51 = vpop.f32.mrf.mxu3  ;;  %v1686_v54 = vadd.f32 %v1685_v50, %v1517_v49  ;;  %v1519_v56 = vpop.f32.mrf.mxu1 }
 0x1f5   : > { %v1520_v60 = vadd.f32 %v1519_v56, %v1350_v55  ;;  %v2601_v55 = vld [vmem:[%s3278_s15 + $0x3c0] sm:$0xf]  ;;  %v2888_v56 = vld [vmem:[%s3278_s15 + $0x3cc] sm:$0xf0] }
 0x1f6   : > { %v1855_v59 = vadd.f32 %v1854_v51, %v1686_v54  ;;  %1389 = vmatmul.bf16.gmra.mxu0 %v2554_v52 }
 0x1f7   : > { %1558 = vmatmul.bf16.gmra.mxu1 %v2558_v53 }
 0x1f8   : > { %1959 = vst [vmem:[%s3363_s19 + $0x128] sm:$0xff] %v1855_v59  ;;  %1727 = vmatmul.bf16.gmra.mxu2 %v2562_v57  ;;  %v2886_v57 = vld [vmem:[%s3278_s15 + $0x3c4] sm:$0xf]  ;;  %v2609_v59 = vld [vmem:[%s3278_s15 + $0x3c8] sm:$0xf] }
 0x1f9   : > { %1896 = vmatmul.bf16.gmra.mxu3 %v2566_v58  ;;  %v2603_v58 = vld [vmem:[%s3278_s15 + $0x3d0] sm:$0xf0] }
 0x1fa   : > { %v2606_v3 = vor.u32 %v2886_v57, %v2603_v58 }
 0x1fb   : > { %v1688_v61 = vpop.f32.mrf.mxu2  ;;  %v1352_v0 = vpop.f32.mrf.mxu0 }
 0x1fc   : > { %v1857_v62 = vpop.f32.mrf.mxu3  ;;  %v1689_v63 = vadd.f32 %v1688_v61, %v1520_v60  ;;  %v1521_v1 = vpop.f32.mrf.mxu1  ;;  %v2889_v60 = vld [vmem:[%s3278_s15 + $0x3d4] sm:$0xf0]  ;;  %v2887_v61 = vld [vmem:[%s3278_s15 + $0x3cc] sm:$0xf] }
 0x1fd   : > { %v1522_v11 = vadd.f32 %v1521_v1, %v1352_v0  ;;  %v2610_v7 = vor.u32 %v2889_v60, %v2609_v59 }
 0x1fe   : > { %v1858_v2 = vadd.f32 %v1857_v62, %v1689_v63  ;;  %v2611_v62 = vld [vmem:[%s3278_s15 + $0x3d8] sm:$0xf0] }
 0x1ff   : > { %v2614_v8 = vor.u32 %v2887_v61, %v2611_v62 }
 0x200   : > { %1960 = vst [vmem:[%s3363_s19 + $0x130] sm:$0xff] %v1858_v2  ;;  %v2602_v2 = vor.u32 %v2888_v56, %v2601_v55 }
 0x203   : > { %v1690_v12 = vpop.f32.mrf.mxu2  ;;  %v1355_v17 = vpop.f32.mrf.mxu0 }
 0x204   : > { %v1859_v13 = vpop.f32.mrf.mxu3  ;;  %v1691_v16 = vadd.f32 %v1690_v12, %v1522_v11  ;;  %v1524_v18 = vpop.f32.mrf.mxu1 }
 0x205   : > { %v1525_v22 = vadd.f32 %v1524_v18, %v1355_v17  ;;  %v2617_v17 = vld [vmem:[%s3278_s15 + $0x3e0] sm:$0xf]  ;;  %v2892_v18 = vld [vmem:[%s3278_s15 + $0x3ec] sm:$0xf0] }
 0x206   : > { %v1860_v21 = vadd.f32 %v1859_v13, %v1691_v16  ;;  %1394 = vmatmul.bf16.gmra.mxu0 %v2570_v14 }
 0x207   : > { %1563 = vmatmul.bf16.gmra.mxu1 %v2574_v15 }
 0x208   : > { %1961 = vst [vmem:[%s3363_s19 + $0x138] sm:$0xff] %v1860_v21  ;;  %1732 = vmatmul.bf16.gmra.mxu2 %v2578_v19  ;;  %v2890_v19 = vld [vmem:[%s3278_s15 + $0x3e4] sm:$0xf]  ;;  %v2625_v21 = vld [vmem:[%s3278_s15 + $0x3e8] sm:$0xf] }
 0x209   : > { %1901 = vmatmul.bf16.gmra.mxu3 %v2582_v20  ;;  %v2619_v20 = vld [vmem:[%s3278_s15 + $0x3f0] sm:$0xf0] }
 0x20a   : > { %v2622_v29 = vor.u32 %v2890_v19, %v2619_v20 }
 0x20b   : > { %v1693_v23 = vpop.f32.mrf.mxu2  ;;  %v1357_v26 = vpop.f32.mrf.mxu0 }
 0x20c   : > { %v1862_v24 = vpop.f32.mrf.mxu3  ;;  %v1694_v25 = vadd.f32 %v1693_v23, %v1525_v22  ;;  %v1526_v27 = vpop.f32.mrf.mxu1  ;;  %v2893_v22 = vld [vmem:[%s3278_s15 + $0x3f4] sm:$0xf0]  ;;  %v2891_v23 = vld [vmem:[%s3278_s15 + $0x3ec] sm:$0xf] }
 0x20d   : > { %v1527_v37 = vadd.f32 %v1526_v27, %v1357_v26  ;;  %v2626_v33 = vor.u32 %v2893_v22, %v2625_v21 }
 0x20e   : > { %v1863_v28 = vadd.f32 %v1862_v24, %v1694_v25  ;;  %v2627_v24 = vld [vmem:[%s3278_s15 + $0x3f8] sm:$0xf0] }
 0x20f   : > { %v2630_v34 = vor.u32 %v2891_v23, %v2627_v24 }
 0x210   : > { %1962 = vst [vmem:[%s3363_s19 + $0x140] sm:$0xff] %v1863_v28  ;;  %v2618_v28 = vor.u32 %v2892_v18, %v2617_v17 }
 0x213   : > { %v1695_v38 = vpop.f32.mrf.mxu2  ;;  %v1360_v43 = vpop.f32.mrf.mxu0 }
 0x214   : > { %v1864_v39 = vpop.f32.mrf.mxu3  ;;  %v1696_v42 = vadd.f32 %v1695_v38, %v1527_v37  ;;  %v1529_v44 = vpop.f32.mrf.mxu1 }
 0x215   : > { %v1530_v48 = vadd.f32 %v1529_v44, %v1360_v43 }
 0x216   : > { %v1865_v47 = vadd.f32 %v1864_v39, %v1696_v42  ;;  %1399 = vmatmul.bf16.gmra.mxu0 %v2586_v40 }
 0x217   : > { %1568 = vmatmul.bf16.gmra.mxu1 %v2590_v41 }
 0x218   : > { %1963 = vst [vmem:[%s3363_s19 + $0x148] sm:$0xff] %v1865_v47  ;;  %1737 = vmatmul.bf16.gmra.mxu2 %v2594_v45 }
 0x219   : > { %1906 = vmatmul.bf16.gmra.mxu3 %v2598_v46 }
 0x21b   : > { %v1698_v49 = vpop.f32.mrf.mxu2  ;;  %v1362_v52 = vpop.f32.mrf.mxu0 }
 0x21c   : > { %v1867_v50 = vpop.f32.mrf.mxu3  ;;  %v1699_v51 = vadd.f32 %v1698_v49, %v1530_v48  ;;  %v1531_v53 = vpop.f32.mrf.mxu1 }
 0x21d   : > { %v1532_v63 = vadd.f32 %v1531_v53, %v1362_v52 }
 0x21e   : > { %v1868_v54 = vadd.f32 %v1867_v50, %v1699_v51 }
 0x220   : > { %1964 = vst [vmem:[%s3363_s19 + $0x150] sm:$0xff] %v1868_v54 }
 0x223   : > { %v1700_v0 = vpop.f32.mrf.mxu2  ;;  %v1365_v5 = vpop.f32.mrf.mxu0 }
 0x224   : > { %v1869_v1 = vpop.f32.mrf.mxu3  ;;  %v1701_v4 = vadd.f32 %v1700_v0, %v1532_v63  ;;  %v1534_v6 = vpop.f32.mrf.mxu1 }
 0x225   : > { %v1535_v10 = vadd.f32 %v1534_v6, %v1365_v5 }
 0x226   : > { %v1870_v9 = vadd.f32 %v1869_v1, %v1701_v4  ;;  %1404 = vmatmul.bf16.gmra.mxu0 %v2602_v2 }
 0x227   : > { %1573 = vmatmul.bf16.gmra.mxu1 %v2606_v3 }
 0x228   : > { %1965 = vst [vmem:[%s3363_s19 + $0x158] sm:$0xff] %v1870_v9  ;;  %1742 = vmatmul.bf16.gmra.mxu2 %v2610_v7 }
 0x229   : > { %1911 = vmatmul.bf16.gmra.mxu3 %v2614_v8 }
 0x22b   : > { %v1703_v11 = vpop.f32.mrf.mxu2  ;;  %v1367_v14 = vpop.f32.mrf.mxu0 }
 0x22c   : > { %v1872_v12 = vpop.f32.mrf.mxu3  ;;  %v1704_v13 = vadd.f32 %v1703_v11, %v1535_v10  ;;  %v1536_v15 = vpop.f32.mrf.mxu1 }
 0x22d   : > { %v1537_v25 = vadd.f32 %v1536_v15, %v1367_v14 }
 0x22e   : > { %v1873_v16 = vadd.f32 %v1872_v12, %v1704_v13 }
 0x230   : > { %1966 = vst [vmem:[%s3363_s19 + $0x160] sm:$0xff] %v1873_v16 }
 0x233   : > { %v1705_v26 = vpop.f32.mrf.mxu2  ;;  %v1370_v31 = vpop.f32.mrf.mxu0 }
 0x234   : > { %v1874_v27 = vpop.f32.mrf.mxu3  ;;  %v1706_v30 = vadd.f32 %v1705_v26, %v1537_v25  ;;  %v1539_v32 = vpop.f32.mrf.mxu1 }
 0x235   : > { %v1540_v36 = vadd.f32 %v1539_v32, %v1370_v31 }
 0x236   : > { %v1875_v35 = vadd.f32 %v1874_v27, %v1706_v30  ;;  %1409 = vmatmul.bf16.gmra.mxu0 %v2618_v28 }
 0x237   : > { %1578 = vmatmul.bf16.gmra.mxu1 %v2622_v29 }
 0x238   : > { %1967 = vst [vmem:[%s3363_s19 + $0x168] sm:$0xff] %v1875_v35  ;;  %1747 = vmatmul.bf16.gmra.mxu2 %v2626_v33 }
 0x239   : > { %1916 = vmatmul.bf16.gmra.mxu3 %v2630_v34 }
 0x23b   : > { %v1708_v37 = vpop.f32.mrf.mxu2  ;;  %v1372_v40 = vpop.f32.mrf.mxu0 }
 0x23c   : > { %v1877_v38 = vpop.f32.mrf.mxu3  ;;  %v1709_v39 = vadd.f32 %v1708_v37, %v1540_v36  ;;  %v1541_v41 = vpop.f32.mrf.mxu1 }
 0x23d   : > { %v1542_v43 = vadd.f32 %v1541_v41, %v1372_v40 }
 0x23e   : > { %v1878_v42 = vadd.f32 %v1877_v38, %v1709_v39 }
 0x240   : > { %1968 = vst [vmem:[%s3363_s19 + $0x170] sm:$0xff] %v1878_v42 }
 0x243   : > { %v1710_v44 = vpop.f32.mrf.mxu2  ;;  %v1375_v47 = vpop.f32.mrf.mxu0 }
 0x244   : > { %v1879_v45 = vpop.f32.mrf.mxu3  ;;  %v1711_v46 = vadd.f32 %v1710_v44, %v1542_v43  ;;  %v1544_v48 = vpop.f32.mrf.mxu1 }
 0x245   : > { %v1545_v50 = vadd.f32 %v1544_v48, %v1375_v47 }
 0x246   : > { %v1880_v49 = vadd.f32 %v1879_v45, %v1711_v46 }
 0x248   : > { %1969 = vst [vmem:[%s3363_s19 + $0x178] sm:$0xff] %v1880_v49 }
 0x24b   : > { %v1713_v51 = vpop.f32.mrf.mxu2  ;;  %v1377_v54 = vpop.f32.mrf.mxu0 }
 0x24c   : > { %v1882_v52 = vpop.f32.mrf.mxu3  ;;  %v1714_v53 = vadd.f32 %v1713_v51, %v1545_v50  ;;  %v1546_v55 = vpop.f32.mrf.mxu1 }
 0x24d   : > { %v1547_v57 = vadd.f32 %v1546_v55, %v1377_v54 }
 0x24e   : > { %v1883_v56 = vadd.f32 %v1882_v52, %v1714_v53 }
 0x250   : > { %1970 = vst [vmem:[%s3363_s19 + $0x180] sm:$0xff] %v1883_v56 }
 0x253   : > { %v1715_v58 = vpop.f32.mrf.mxu2  ;;  %v1380_v61 = vpop.f32.mrf.mxu0 }
 0x254   : > { %v1884_v59 = vpop.f32.mrf.mxu3  ;;  %v1716_v60 = vadd.f32 %v1715_v58, %v1547_v57  ;;  %v1549_v62 = vpop.f32.mrf.mxu1 }
 0x255   : > { %v1550_v0 = vadd.f32 %v1549_v62, %v1380_v61 }
 0x256   : > { %v1885_v63 = vadd.f32 %v1884_v59, %v1716_v60 }
 0x258   : > { %1971 = vst [vmem:[%s3363_s19 + $0x188] sm:$0xff] %v1885_v63 }
 0x25b   : > { %v1718_v1 = vpop.f32.mrf.mxu2  ;;  %v1382_v4 = vpop.f32.mrf.mxu0 }
 0x25c   : > { %v1887_v2 = vpop.f32.mrf.mxu3  ;;  %v1719_v3 = vadd.f32 %v1718_v1, %v1550_v0  ;;  %v1551_v5 = vpop.f32.mrf.mxu1 }
 0x25d   : > { %v1552_v7 = vadd.f32 %v1551_v5, %v1382_v4 }
 0x25e   : > { %v1888_v6 = vadd.f32 %v1887_v2, %v1719_v3 }
 0x260   : > { %1972 = vst [vmem:[%s3363_s19 + $0x190] sm:$0xff] %v1888_v6 }
 0x263   : > { %v1720_v8 = vpop.f32.mrf.mxu2  ;;  %v1385_v11 = vpop.f32.mrf.mxu0 }
 0x264   : > { %v1889_v9 = vpop.f32.mrf.mxu3  ;;  %v1721_v10 = vadd.f32 %v1720_v8, %v1552_v7  ;;  %v1554_v12 = vpop.f32.mrf.mxu1 }
 0x265   : > { %v1555_v14 = vadd.f32 %v1554_v12, %v1385_v11 }
 0x266   : > { %v1890_v13 = vadd.f32 %v1889_v9, %v1721_v10 }
 0x268   : > { %1973 = vst [vmem:[%s3363_s19 + $0x198] sm:$0xff] %v1890_v13 }
 0x26b   : > { %v1723_v15 = vpop.f32.mrf.mxu2  ;;  %v1387_v18 = vpop.f32.mrf.mxu0 }
 0x26c   : > { %v1892_v16 = vpop.f32.mrf.mxu3  ;;  %v1724_v17 = vadd.f32 %v1723_v15, %v1555_v14  ;;  %v1556_v19 = vpop.f32.mrf.mxu1 }
 0x26d   : > { %v1557_v21 = vadd.f32 %v1556_v19, %v1387_v18 }
 0x26e   : > { %v1893_v20 = vadd.f32 %v1892_v16, %v1724_v17 }
 0x270   : > { %1974 = vst [vmem:[%s3363_s19 + $0x1a0] sm:$0xff] %v1893_v20 }
 0x273   : > { %v1725_v22 = vpop.f32.mrf.mxu2  ;;  %v1390_v25 = vpop.f32.mrf.mxu0 }
 0x274   : > { %v1894_v23 = vpop.f32.mrf.mxu3  ;;  %v1726_v24 = vadd.f32 %v1725_v22, %v1557_v21  ;;  %v1559_v26 = vpop.f32.mrf.mxu1 }
 0x275   : > { %v1560_v28 = vadd.f32 %v1559_v26, %v1390_v25 }
 0x276   : > { %v1895_v27 = vadd.f32 %v1894_v23, %v1726_v24 }
 0x278   : > { %1975 = vst [vmem:[%s3363_s19 + $0x1a8] sm:$0xff] %v1895_v27 }
 0x27b   : > { %v1728_v29 = vpop.f32.mrf.mxu2  ;;  %v1392_v32 = vpop.f32.mrf.mxu0 }
 0x27c   : > { %v1897_v30 = vpop.f32.mrf.mxu3  ;;  %v1729_v31 = vadd.f32 %v1728_v29, %v1560_v28  ;;  %v1561_v33 = vpop.f32.mrf.mxu1 }
 0x27d   : > { %v1562_v35 = vadd.f32 %v1561_v33, %v1392_v32 }
 0x27e   : > { %v1898_v34 = vadd.f32 %v1897_v30, %v1729_v31 }
 0x280   : > { %1976 = vst [vmem:[%s3363_s19 + $0x1b0] sm:$0xff] %v1898_v34 }
 0x283   : > { %v1730_v36 = vpop.f32.mrf.mxu2  ;;  %v1395_v39 = vpop.f32.mrf.mxu0 }
 0x284   : > { %v1899_v37 = vpop.f32.mrf.mxu3  ;;  %v1731_v38 = vadd.f32 %v1730_v36, %v1562_v35  ;;  %v1564_v40 = vpop.f32.mrf.mxu1 }
 0x285   : > { %v1565_v42 = vadd.f32 %v1564_v40, %v1395_v39 }
 0x286   : > { %v1900_v41 = vadd.f32 %v1899_v37, %v1731_v38 }
 0x288   : > { %1977 = vst [vmem:[%s3363_s19 + $0x1b8] sm:$0xff] %v1900_v41 }
 0x28b   : > { %v1733_v43 = vpop.f32.mrf.mxu2  ;;  %v1397_v46 = vpop.f32.mrf.mxu0 }
 0x28c   : > { %v1902_v44 = vpop.f32.mrf.mxu3  ;;  %v1734_v45 = vadd.f32 %v1733_v43, %v1565_v42  ;;  %v1566_v47 = vpop.f32.mrf.mxu1 }
 0x28d   : > { %v1567_v49 = vadd.f32 %v1566_v47, %v1397_v46 }
 0x28e   : > { %v1903_v48 = vadd.f32 %v1902_v44, %v1734_v45 }
 0x290   : > { %1978 = vst [vmem:[%s3363_s19 + $0x1c0] sm:$0xff] %v1903_v48 }
 0x293   : > { %v1735_v50 = vpop.f32.mrf.mxu2  ;;  %v1400_v53 = vpop.f32.mrf.mxu0 }
 0x294   : > { %v1904_v51 = vpop.f32.mrf.mxu3  ;;  %v1736_v52 = vadd.f32 %v1735_v50, %v1567_v49  ;;  %v1569_v54 = vpop.f32.mrf.mxu1 }
 0x295   : > { %v1570_v56 = vadd.f32 %v1569_v54, %v1400_v53 }
 0x296   : > { %v1905_v55 = vadd.f32 %v1904_v51, %v1736_v52 }
 0x298   : > { %1979 = vst [vmem:[%s3363_s19 + $0x1c8] sm:$0xff] %v1905_v55 }
 0x29b   : > { %v1738_v57 = vpop.f32.mrf.mxu2  ;;  %v1402_v60 = vpop.f32.mrf.mxu0 }
 0x29c   : > { %v1907_v58 = vpop.f32.mrf.mxu3  ;;  %v1739_v59 = vadd.f32 %v1738_v57, %v1570_v56  ;;  %v1571_v61 = vpop.f32.mrf.mxu1 }
 0x29d   : > { %v1572_v63 = vadd.f32 %v1571_v61, %v1402_v60 }
 0x29e   : > { %v1908_v62 = vadd.f32 %v1907_v58, %v1739_v59 }
 0x2a0   : > { %1980 = vst [vmem:[%s3363_s19 + $0x1d0] sm:$0xff] %v1908_v62 }
 0x2a3   : > { %v1740_v0 = vpop.f32.mrf.mxu2  ;;  %v1405_v3 = vpop.f32.mrf.mxu0 }
 0x2a4   : > { %v1909_v1 = vpop.f32.mrf.mxu3  ;;  %v1741_v2 = vadd.f32 %v1740_v0, %v1572_v63  ;;  %v1574_v4 = vpop.f32.mrf.mxu1 }
 0x2a5   : > { %v1575_v6 = vadd.f32 %v1574_v4, %v1405_v3 }
 0x2a6   : > { %v1910_v5 = vadd.f32 %v1909_v1, %v1741_v2 }
 0x2a8   : > { %1981 = vst [vmem:[%s3363_s19 + $0x1d8] sm:$0xff] %v1910_v5 }
 0x2ab   : > { %v1743_v7 = vpop.f32.mrf.mxu2  ;;  %v1407_v10 = vpop.f32.mrf.mxu0 }
 0x2ac   : > { %v1912_v8 = vpop.f32.mrf.mxu3  ;;  %v1744_v9 = vadd.f32 %v1743_v7, %v1575_v6  ;;  %v1576_v11 = vpop.f32.mrf.mxu1 }
 0x2ad   : > { %v1577_v13 = vadd.f32 %v1576_v11, %v1407_v10 }
 0x2ae   : > { %v1913_v12 = vadd.f32 %v1912_v8, %v1744_v9 }
 0x2b0   : > { %1982 = vst [vmem:[%s3363_s19 + $0x1e0] sm:$0xff] %v1913_v12 }
 0x2b3   : > { %v1745_v14 = vpop.f32.mrf.mxu2  ;;  %v1410_v17 = vpop.f32.mrf.mxu0 }
 0x2b4   : > { %v1914_v15 = vpop.f32.mrf.mxu3  ;;  %v1746_v16 = vadd.f32 %v1745_v14, %v1577_v13  ;;  %v1579_v18 = vpop.f32.mrf.mxu1 }
 0x2b5   : > { %v1580_v20 = vadd.f32 %v1579_v18, %v1410_v17 }
 0x2b6   : > { %v1915_v19 = vadd.f32 %v1914_v15, %v1746_v16 }
 0x2b8   : > { %1983 = vst [vmem:[%s3363_s19 + $0x1e8] sm:$0xff] %v1915_v19 }
 0x2bb   : > { %v1748_v21 = vpop.f32.mrf.mxu2  ;;  %v1412_v25 = vpop.f32.mrf.mxu0 }
 0x2bc   : > { %v1917_v22 = vpop.f32.mrf.mxu3  ;;  %v1749_v23 = vadd.f32 %v1748_v21, %v1580_v20  ;;  %v1581_v26 = vpop.f32.mrf.mxu1 }
 0x2bd   : > { %v1582_v27 = vadd.f32 %v1581_v26, %v1412_v25 }
 0x2be   : > { %v1918_v24 = vadd.f32 %v1917_v22, %v1749_v23 }
 0x2c0   : > { %1984 = vst [vmem:[%s3363_s19 + $0x1f0] sm:$0xff] %v1918_v24 }
 0x2c3   : > { %v1750_v28 = vpop.f32.mrf.mxu2 }
 0x2c4   : > { %v1751_v29 = vadd.f32 %v1750_v28, %v1582_v27  ;;  %v1919_v30 = vpop.f32.mrf.mxu3 }
 0x2c6   : > { %v1920_v31 = vadd.f32 %v1919_v30, %v1751_v29 }
 0x2c8   : > { %1985 = vst [vmem:[%s3363_s19 + $0x1f8] sm:$0xff] %v1920_v31 }
 0x2c9   : > { %3093 = shalt.err (!%p3090_p12)
}
 0x2ca   : > { %s3159_s30 = smov 128   ;;  %s3160_s7 = smov 8  }
 0x2cb   : > { %2933 = dma.vmem_to_hbm [thread:$0]  (%p3254_p3), %s2001_s21, 8192, %s2003_s22, %s1987_s12, %s3159_s30, %s3159_s30, %s3160_s7  }
 0x2cc PF: > { %p2950_p13 = scmp.ge.s32.totalorder %s3152_s14, 2  ;;  %s2017_s15 = sand.u32 1, %s3132_s9  }
 0x2cd   : > { %s2018_s17 = scalar_lea.sflag [#allocation4], %s2017_s15 }
 0x2ce   : > { %p2944_p0 = pnand %p2950_p13, %p3225_p6 }
 0x2d0   : > { %p2945_p5 = pneg %p2944_p0 }
 0x2d2   : > { %3127 = dma.done.wait (%p2945_p5), %s2018_s17, 8192  }
 0x2d3   : > { %3129 = vsyncadd (%p2945_p5), %s2018_s17, 4294959104  ;;  %s19_s14 = sadd.s32 1, %s3152_s14   ;;  %s3659_s9 = smov %s3136_s10 }
 0x2d4   : > { %p16_p7 = scmp.ge.s32.totalorder %s19_s14, 18   ;;  %s3660_s10 = smov %s3140_s11 }
 0x2d5   : > { %s3661_s11 = smov %s3263_s8  ;;  %s3662_s12 = smov %s3148_s13 }
 0x2d6   : > { %s3663_s13 = smov %s3665_s29  ;;  %18 = sbr.rel (!%p16_p7) target bundleno = 7 (0x7), region = 78 }
 0x2db   :  { %2024 = vsyncpa [#allocation3], 1 }
 0x2dc   :  { %2026 = vsyncpa [#allocation3 + $0x1], 1 }
 0x2dd   :  { %2027 = vsyncpa [#allocation6], 1 }
 0x2de   :  { %2028 = vsyncpa [#allocation4], 1 }
 0x2df   :  { %2030 = vsyncpa [#allocation4 + $0x1], 1 }

</bundles_post_ra>
